<compile_context>
chip_gen: v6e
topology: v6e:2x2x1
jax: 0.10.0
libtpu: 0.0.40
codegen_flags: <defaults>
</compile_context>

<pallas_src>
import jax
import jax.numpy as jnp
from jax.experimental import pallas as pl
from jax.experimental.pallas import tpu as pltpu


# ----------------------------------------------------------------------------
# Glue: im2col with pool-tap-major spatial ordering (pure XLA, fused under jit)
# ----------------------------------------------------------------------------
def _im2col_tap_major(x, k):
    """x: (B, C, H, W) -> (B, C*k*k, 4 * (Ho//2) * (Wo//2)).

    Patch-element order is (c, kh, kw) (matches PyTorch weight.reshape(Cout,-1)).
    Spatial order is m = tap*S + a*(Wo//2) + c with tap = p*2+q, output position
    (ho, wo) = (2a+p, 2c+q), S = (Ho//2)*(Wo//2): the four 2x2-pool taps are
    contiguous blocks so pooling is a max of 4 contiguous lane slices in-kernel.
    """
    B, C, H, W = x.shape
    Ho, Wo = H - k + 1, W - k + 1
    Hp, Wp = Ho // 2, Wo // 2
    slabs = [x[:, :, kh:kh + Ho, kw:kw + Wo]
             for kh in range(k) for kw in range(k)]          # each (B, C, Ho, Wo)
    p = jnp.stack(slabs, axis=2)                             # (B, C, k*k, Ho, Wo)
    p = p.reshape(B, C * k * k, Ho, Wo)                      # kdim = c*k*k + kh*k + kw
    p = p.reshape(B, C * k * k, Hp, 2, Wp, 2)                # (b, kdim, a, p, c, q)
    p = p.transpose(0, 1, 3, 5, 2, 4)                        # (b, kdim, p, q, a, c)
    return p.reshape(B, C * k * k, 4 * Hp * Wp)


# ----------------------------------------------------------------------------
# Pallas kernels
# ----------------------------------------------------------------------------
def _conv_relu_pool_kernel(p_ref, w_ref, b_ref, o_ref):
    """One image: conv (as matmul on tap-major patches) + bias + ReLU + 2x2 pool.

    p_ref: (1, K, 4*S)   tap-major patches^T for this image
    w_ref: (Cout, K)     flattened conv weight
    b_ref: (Cout, 1)
    o_ref: (1, Cout, S)  pooled output, lane index = a*(Wo//2)+c (row-major)
    """
    S = o_ref.shape[2]
    c = jnp.dot(w_ref[...], p_ref[0], preferred_element_type=jnp.float32)
    c = jnp.maximum(c + b_ref[...], 0.0)
    pooled = jnp.maximum(jnp.maximum(c[:, 0 * S:1 * S], c[:, 1 * S:2 * S]),
                         jnp.maximum(c[:, 2 * S:3 * S], c[:, 3 * S:4 * S]))
    o_ref[0] = pooled.astype(o_ref.dtype)


def _conv_pool_fc_kernel(p_ref, w_ref, b_ref, wf1_ref, bf1_ref, wf2_ref, bf2_ref,
                         wf3_ref, bf3_ref, o_ref, fcin_ref):
    """One image: conv2 + ReLU + pool + NCHW flatten + fc1/fc2/fc3 (VMEM resident)."""
    S = p_ref.shape[2] // 4                                   # 25 pooled positions
    c = jnp.dot(w_ref[...], p_ref[0], preferred_element_type=jnp.float32)
    c = jnp.maximum(c + b_ref[...], 0.0)                      # (Cout, 4*S)
    z = jnp.maximum(jnp.maximum(c[:, 0 * S:1 * S], c[:, 1 * S:2 * S]),
                    jnp.maximum(c[:, 2 * S:3 * S], c[:, 3 * S:4 * S]))  # (Cout, S)

    # torch.flatten(x, 1) order: index = co*S + s  (channel-major, spatial-minor)
    for co in range(z.shape[0]):
        fcin_ref[:, co * S:(co + 1) * S] = z[co:co + 1, :]

    h = jnp.dot(fcin_ref[...], wf1_ref[...], preferred_element_type=jnp.float32)
    h = jnp.maximum(h + bf1_ref[...], 0.0)
    h = jnp.dot(h, wf2_ref[...], preferred_element_type=jnp.float32)
    h = jnp.maximum(h + bf2_ref[...], 0.0)
    y = jnp.dot(h, wf3_ref[...], preferred_element_type=jnp.float32) + bf3_ref[...]
    o_ref[0] = y.astype(o_ref.dtype)


# ----------------------------------------------------------------------------
# pallas_call wrappers
# ----------------------------------------------------------------------------
def conv_relu_pool(p_tap, w_flat, b):
    """p_tap: (B, K, 4*S), w_flat: (Cout, K), b: (Cout,) -> (B, Cout, S)."""
    B, Kd, M4 = p_tap.shape
    S = M4 // 4
    Cout = w_flat.shape[0]
    return pl.pallas_call(
        _conv_relu_pool_kernel,
        out_shape=jax.ShapeDtypeStruct((B, Cout, S), jnp.float32),
        grid=(B,),
        in_specs=[pl.BlockSpec((1, Kd, M4), lambda bi: (bi, 0, 0)),
                  pl.BlockSpec((Cout, Kd), lambda bi: (0, 0)),
                  pl.BlockSpec((Cout, 1), lambda bi: (0, 0))],
        out_specs=pl.BlockSpec((1, Cout, S), lambda bi: (bi, 0, 0)),
        compiler_params=pltpu.CompilerParams(dimension_semantics=("parallel",)),
    )(p_tap.astype(jnp.float32), w_flat.astype(jnp.float32),
      b.reshape(Cout, 1).astype(jnp.float32))


def conv_pool_fc(p_tap, w_conv, b_conv, fc1_w, fc1_b, fc2_w, fc2_b, fc3_w, fc3_b):
    """Fused conv2 stage + classifier head. Returns logits (B, NC)."""
    B, Kd, M4 = p_tap.shape
    S = M4 // 4
    Cout = w_conv.shape[0]
    F = Cout * S                      # 400
    H1, H2, NC = fc1_w.shape[0], fc2_w.shape[0], fc3_w.shape[0]

    out = pl.pallas_call(
        _conv_pool_fc_kernel,
        out_shape=jax.ShapeDtypeStruct((B, 1, NC), jnp.float32),
        grid=(B,),
        in_specs=[pl.BlockSpec((1, Kd, M4), lambda bi: (bi, 0, 0)),
                  pl.BlockSpec((Cout, Kd), lambda bi: (0, 0)),
                  pl.BlockSpec((Cout, 1), lambda bi: (0, 0)),
                  pl.BlockSpec((F, H1), lambda bi: (0, 0)),
                  pl.BlockSpec((1, H1), lambda bi: (0, 0)),
                  pl.BlockSpec((H1, H2), lambda bi: (0, 0)),
                  pl.BlockSpec((1, H2), lambda bi: (0, 0)),
                  pl.BlockSpec((H2, NC), lambda bi: (0, 0)),
                  pl.BlockSpec((1, NC), lambda bi: (0, 0))],
        out_specs=pl.BlockSpec((1, 1, NC), lambda bi: (bi, 0, 0)),
        scratch_shapes=[pltpu.VMEM((1, F), jnp.float32)],
        compiler_params=pltpu.CompilerParams(dimension_semantics=("parallel",)),
    )(p_tap.astype(jnp.float32),
      w_conv.astype(jnp.float32), b_conv.reshape(Cout, 1).astype(jnp.float32),
      fc1_w.T.astype(jnp.float32), fc1_b.reshape(1, H1).astype(jnp.float32),
      fc2_w.T.astype(jnp.float32), fc2_b.reshape(1, H2).astype(jnp.float32),
      fc3_w.T.astype(jnp.float32), fc3_b.reshape(1, NC).astype(jnp.float32))
    return out.reshape(B, NC)


# ----------------------------------------------------------------------------
# The Net forward pass
# ----------------------------------------------------------------------------
@jax.jit
def net_forward(x, params):
    """x: (B, 3, 32, 32) NCHW float32 -> logits (B, 10)."""
    B = x.shape[0]

    # conv1 (3->6, k=5) + ReLU + maxpool 2x2, fused in one kernel
    p1 = _im2col_tap_major(x.astype(jnp.float32), 5)          # (B, 75, 784)
    w1 = params["conv1_w"].reshape(6, -1)                     # (6, 75)
    c1p = conv_relu_pool(p1, w1, params["conv1_b"])           # (B, 6, 196)

    # conv2 (6->16, k=5) + ReLU + maxpool 2x2 + flatten + fc1/fc2/fc3, one kernel
    x2 = c1p.reshape(B, 6, 14, 14)
    p2 = _im2col_tap_major(x2, 5)                             # (B, 150, 100)
    w2 = params["conv2_w"].reshape(16, -1)                    # (16, 150)
    logits = conv_pool_fc(p2, w2, params["conv2_b"],
                          params["fc1_w"], params["fc1_b"],
                          params["fc2_w"], params["fc2_b"],
                          params["fc3_w"], params["fc3_b"])   # (B, 10)
    return logits


# ----------------------------------------------------------------------------
# Params + pure-JAX reference (for a correctness self-check)
# ----------------------------------------------------------------------------
def init_params(key):
    ks = jax.random.split(key, 10)

    def w(k, shape, fan_in):
        return (jax.random.normal(k, shape, jnp.float32) /
                jnp.sqrt(jnp.float32(fan_in))).astype(jnp.float32)

    return {
        "conv1_w": w(ks[0], (6, 3, 5, 5), 3 * 5 * 5),
        "conv1_b": w(ks[1], (6,), 3 * 5 * 5),
        "conv2_w": w(ks[2], (16, 6, 5, 5), 6 * 5 * 5),
        "conv2_b": w(ks[3], (16,), 6 * 5 * 5),
        "fc1_w": w(ks[4], (120, 16 * 5 * 5), 400),
        "fc1_b": w(ks[5], (120,), 400),
        "fc2_w": w(ks[6], (84, 120), 120),
        "fc2_b": w(ks[7], (84,), 120),
        "fc3_w": w(ks[8], (10, 84), 84),
        "fc3_b": w(ks[9], (10,), 84),
    }


def reference_forward(x, params):
    def conv(h, w, b):
        out = jax.lax.conv_general_dilated(
            h, w, window_strides=(1, 1), padding="VALID",
            dimension_numbers=("NCHW", "OIHW", "NCHW"))
        return out + b.reshape(1, -1, 1, 1)

    def pool(h):
        return jnp.maximum(
            jnp.maximum(h[:, :, 0::2, 0::2], h[:, :, 0::2, 1::2]),
            jnp.maximum(h[:, :, 1::2, 0::2], h[:, :, 1::2, 1::2]))

    h = pool(jax.nn.relu(conv(x, params["conv1_w"], params["conv1_b"])))
    h = pool(jax.nn.relu(conv(h, params["conv2_w"], params["conv2_b"])))
    h = h.reshape(h.shape[0], -1)
    h = jax.nn.relu(h @ params["fc1_w"].T + params["fc1_b"])
    h = jax.nn.relu(h @ params["fc2_w"].T + params["fc2_b"])
    return h @ params["fc3_w"].T + params["fc3_b"]


if __name__ == "__main__":
    key = jax.random.PRNGKey(0)
    k_in, k_par = jax.random.split(key)

    # Architecture implies 32x32 inputs (16*5*5 = 400 after two conv+pool stages).
    x = jax.random.normal(k_in, (2, 3, 32, 32), jnp.float32)
    params = init_params(k_par)

    logits = net_forward(x, params)
    logits = jax.block_until_ready(logits)
    assert logits.shape == (2, 10)
    assert bool(jnp.all(jnp.isfinite(logits)))

    ref = reference_forward(x, params)
    assert bool(jnp.allclose(logits, ref, atol=5e-2, rtol=5e-2)), (
        "max abs diff vs reference: %f" % float(jnp.max(jnp.abs(logits - ref))))
    print("KERNEL_OK")
</pallas_src>

<mosaic_0001>
module attributes {stable_mosaic.version = 11 : i64} {
  func.func @_conv_relu_pool_kernel(%arg0: i32, %arg1: memref<1x75x784xf32, #tpu.memory_space<vmem>>, %arg2: memref<6x75xf32, #tpu.memory_space<vmem>>, %arg3: memref<6x1xf32, #tpu.memory_space<vmem>>, %arg4: memref<1x6x196xf32, #tpu.memory_space<vmem>>) attributes {dimension_semantics = [#tpu.dimension_semantics<parallel>], iteration_bounds = array<i64: 2>, scalar_prefetch = 0 : i64, scratch_operands = 0 : i64, tpu.core_type = #tpu.core_type<tc>, window_params = [{transform_indices = @transform_0, window_bounds = array<i64: 1, 75, 784>}, {pipeline_mode = #tpu.pipeline_mode<synchronous>, transform_indices = @transform_1, window_bounds = array<i64: 6, 75>}, {pipeline_mode = #tpu.pipeline_mode<synchronous>, transform_indices = @transform_2, window_bounds = array<i64: 6, 1>}, {transform_indices = @transform_3, window_bounds = array<i64: 1, 6, 196>}]} {
    %c0 = arith.constant 0 : index
    %c0_0 = arith.constant 0 : index
    %0 = vector.load %arg2[%c0, %c0_0] : memref<6x75xf32, #tpu.memory_space<vmem>>, vector<6x75xf32>
    %c0_1 = arith.constant 0 : index
    %c0_2 = arith.constant 0 : index
    %c0_3 = arith.constant 0 : index
    %1 = vector.load %arg1[%c0_1, %c0_2, %c0_3] : memref<1x75x784xf32, #tpu.memory_space<vmem>>, vector<1x75x784xf32>
    %2 = vector.shape_cast %1 : vector<1x75x784xf32> to vector<75x784xf32>
    %cst = arith.constant dense<0.000000e+00> : vector<6x784xf32>
    %3 = tpu.matmul %0, %2, %cst {dimension_numbers = #tpu.dot_dimension_numbers<[1], [0], [0], [1], [0, 0, 1, 1], [], []>} : vector<6x75xf32>, vector<75x784xf32>, vector<6x784xf32> -> vector<6x784xf32>
    %c0_4 = arith.constant 0 : index
    %c0_5 = arith.constant 0 : index
    %4 = vector.load %arg3[%c0_4, %c0_5] : memref<6x1xf32, #tpu.memory_space<vmem>>, vector<6x1xf32>
    %5 = vector.broadcast %4 : vector<6x1xf32> to vector<6x784xf32>
    %6 = arith.addf %3, %5 : vector<6x784xf32>
    %cst_6 = arith.constant 0.000000e+00 : f32
    %7 = vector.broadcast %cst_6 : f32 to vector<6x784xf32>
    %8 = arith.maximumf %6, %7 : vector<6x784xf32>
    %9 = vector.extract_strided_slice %8 {offsets = [0, 0], sizes = [6, 196], strides = [1, 1]} : vector<6x784xf32> to vector<6x196xf32>
    %10 = vector.extract_strided_slice %8 {offsets = [0, 196], sizes = [6, 196], strides = [1, 1]} : vector<6x784xf32> to vector<6x196xf32>
    %11 = arith.maximumf %9, %10 : vector<6x196xf32>
    %12 = vector.extract_strided_slice %8 {offsets = [0, 392], sizes = [6, 196], strides = [1, 1]} : vector<6x784xf32> to vector<6x196xf32>
    %13 = vector.extract_strided_slice %8 {offsets = [0, 588], sizes = [6, 196], strides = [1, 1]} : vector<6x784xf32> to vector<6x196xf32>
    %14 = arith.maximumf %12, %13 : vector<6x196xf32>
    %15 = arith.maximumf %11, %14 : vector<6x196xf32>
    %c0_7 = arith.constant 0 : index
    %c0_8 = arith.constant 0 : index
    %c0_9 = arith.constant 0 : index
    %16 = vector.load %arg4[%c0_7, %c0_8, %c0_9] : memref<1x6x196xf32, #tpu.memory_space<vmem>>, vector<1x6x196xf32>
    %17 = vector.shape_cast %16 : vector<1x6x196xf32> to vector<6x196xf32>
    %18 = vector.shape_cast %15 : vector<6x196xf32> to vector<1x6x196xf32>
    tpu.vector_store %arg4[%c0_7, %c0_8, %c0_9], %18 {strides = array<i32>} : memref<1x6x196xf32, #tpu.memory_space<vmem>>, vector<1x6x196xf32>,
    return
  }
  func.func @transform_0(%arg0: i32) -> (i32, i32, i32) {
    %c0_i32 = arith.constant 0 : i32
    %c0_i32_0 = arith.constant 0 : i32
    %c0_i32_1 = arith.constant 0 : i32
    return %arg0, %c0_i32, %c0_i32_0 : i32, i32, i32
  }
  func.func @transform_1(%arg0: i32) -> (i32, i32) {
    %c0_i32 = arith.constant 0 : i32
    %c0_i32_0 = arith.constant 0 : i32
    %c0_i32_1 = arith.constant 0 : i32
    return %c0_i32, %c0_i32_0 : i32, i32
  }
  func.func @transform_2(%arg0: i32) -> (i32, i32) {
    %c0_i32 = arith.constant 0 : i32
    %c0_i32_0 = arith.constant 0 : i32
    %c0_i32_1 = arith.constant 0 : i32
    return %c0_i32, %c0_i32_0 : i32, i32
  }
  func.func @transform_3(%arg0: i32) -> (i32, i32, i32) {
    %c0_i32 = arith.constant 0 : i32
    %c0_i32_0 = arith.constant 0 : i32
    %c0_i32_1 = arith.constant 0 : i32
    return %arg0, %c0_i32, %c0_i32_0 : i32, i32, i32
  }
}

module attributes {stable_mosaic.version = 11 : i64} {
  func.func @_conv_pool_fc_kernel(%arg0: i32, %arg1: memref<1x150x100xf32, #tpu.memory_space<vmem>>, %arg2: memref<16x150xf32, #tpu.memory_space<vmem>>, %arg3: memref<16x1xf32, #tpu.memory_space<vmem>>, %arg4: memref<400x120xf32, #tpu.memory_space<vmem>>, %arg5: memref<1x120xf32, #tpu.memory_space<vmem>>, %arg6: memref<120x84xf32, #tpu.memory_space<vmem>>, %arg7: memref<1x84xf32, #tpu.memory_space<vmem>>, %arg8: memref<84x10xf32, #tpu.memory_space<vmem>>, %arg9: memref<1x10xf32, #tpu.memory_space<vmem>>, %arg10: memref<1x1x10xf32, #tpu.memory_space<vmem>>, %arg11: memref<1x400xf32, #tpu.memory_space<vmem>>) attributes {dimension_semantics = [#tpu.dimension_semantics<parallel>], iteration_bounds = array<i64: 2>, scalar_prefetch = 0 : i64, scratch_operands = 1 : i64, tpu.core_type = #tpu.core_type<tc>, window_params = [{transform_indices = @transform_0, window_bounds = array<i64: 1, 150, 100>}, {pipeline_mode = #tpu.pipeline_mode<synchronous>, transform_indices = @transform_1, window_bounds = array<i64: 16, 150>}, {pipeline_mode = #tpu.pipeline_mode<synchronous>, transform_indices = @transform_2, window_bounds = array<i64: 16, 1>}, {pipeline_mode = #tpu.pipeline_mode<synchronous>, transform_indices = @transform_3, window_bounds = array<i64: 400, 120>}, {pipeline_mode = #tpu.pipeline_mode<synchronous>, transform_indices = @transform_4, window_bounds = array<i64: 1, 120>}, {pipeline_mode = #tpu.pipeline_mode<synchronous>, transform_indices = @transform_5, window_bounds = array<i64: 120, 84>}, {pipeline_mode = #tpu.pipeline_mode<synchronous>, transform_indices = @transform_6, window_bounds = array<i64: 1, 84>}, {pipeline_mode = #tpu.pipeline_mode<synchronous>, transform_indices = @transform_7, window_bounds = array<i64: 84, 10>}, {pipeline_mode = #tpu.pipeline_mode<synchronous>, transform_indices = @transform_8, window_bounds = array<i64: 1, 10>}, {transform_indices = @transform_9, window_bounds = array<i64: 1, 1, 10>}]} {
    %c0 = arith.constant 0 : index
    %c0_0 = arith.constant 0 : index
    %0 = vector.load %arg2[%c0, %c0_0] : memref<16x150xf32, #tpu.memory_space<vmem>>, vector<16x150xf32>
    %c0_1 = arith.constant 0 : index
    %c0_2 = arith.constant 0 : index
    %c0_3 = arith.constant 0 : index
    %1 = vector.load %arg1[%c0_1, %c0_2, %c0_3] : memref<1x150x100xf32, #tpu.memory_space<vmem>>, vector<1x150x100xf32>
    %2 = vector.shape_cast %1 : vector<1x150x100xf32> to vector<150x100xf32>
    %cst = arith.constant dense<0.000000e+00> : vector<16x100xf32>
    %3 = tpu.matmul %0, %2, %cst {dimension_numbers = #tpu.dot_dimension_numbers<[1], [0], [0], [1], [0, 0, 1, 1], [], []>} : vector<16x150xf32>, vector<150x100xf32>, vector<16x100xf32> -> vector<16x100xf32>
    %c0_4 = arith.constant 0 : index
    %c0_5 = arith.constant 0 : index
    %4 = vector.load %arg3[%c0_4, %c0_5] : memref<16x1xf32, #tpu.memory_space<vmem>>, vector<16x1xf32>
    %5 = vector.broadcast %4 : vector<16x1xf32> to vector<16x100xf32>
    %6 = arith.addf %3, %5 : vector<16x100xf32>
    %cst_6 = arith.constant 0.000000e+00 : f32
    %7 = vector.broadcast %cst_6 : f32 to vector<16x100xf32>
    %8 = arith.maximumf %6, %7 : vector<16x100xf32>
    %9 = vector.extract_strided_slice %8 {offsets = [0, 0], sizes = [16, 25], strides = [1, 1]} : vector<16x100xf32> to vector<16x25xf32>
    %10 = vector.extract_strided_slice %8 {offsets = [0, 25], sizes = [16, 25], strides = [1, 1]} : vector<16x100xf32> to vector<16x25xf32>
    %11 = arith.maximumf %9, %10 : vector<16x25xf32>
    %12 = vector.extract_strided_slice %8 {offsets = [0, 50], sizes = [16, 25], strides = [1, 1]} : vector<16x100xf32> to vector<16x25xf32>
    %13 = vector.extract_strided_slice %8 {offsets = [0, 75], sizes = [16, 25], strides = [1, 1]} : vector<16x100xf32> to vector<16x25xf32>
    %14 = arith.maximumf %12, %13 : vector<16x25xf32>
    %15 = arith.maximumf %11, %14 : vector<16x25xf32>
    %16 = vector.extract_strided_slice %15 {offsets = [0, 0], sizes = [1, 25], strides = [1, 1]} : vector<16x25xf32> to vector<1x25xf32>
    %c0_7 = arith.constant 0 : index
    %c0_8 = arith.constant 0 : index
    %17 = vector.load %arg11[%c0_7, %c0_8] : memref<1x400xf32, #tpu.memory_space<vmem>>, vector<1x25xf32>
    tpu.vector_store %arg11[%c0_7, %c0_8], %16 {strides = array<i32>} : memref<1x400xf32, #tpu.memory_space<vmem>>, vector<1x25xf32>,
    %18 = vector.extract_strided_slice %15 {offsets = [1, 0], sizes = [1, 25], strides = [1, 1]} : vector<16x25xf32> to vector<1x25xf32>
    %c0_9 = arith.constant 0 : index
    %c25 = arith.constant 25 : index
    %19 = vector.load %arg11[%c0_9, %c25] : memref<1x400xf32, #tpu.memory_space<vmem>>, vector<1x25xf32>
    tpu.vector_store %arg11[%c0_9, %c25], %18 {strides = array<i32>} : memref<1x400xf32, #tpu.memory_space<vmem>>, vector<1x25xf32>,
    %20 = vector.extract_strided_slice %15 {offsets = [2, 0], sizes = [1, 25], strides = [1, 1]} : vector<16x25xf32> to vector<1x25xf32>
    %c0_10 = arith.constant 0 : index
    %c50 = arith.constant 50 : index
    %21 = vector.load %arg11[%c0_10, %c50] : memref<1x400xf32, #tpu.memory_space<vmem>>, vector<1x25xf32>
    tpu.vector_store %arg11[%c0_10, %c50], %20 {strides = array<i32>} : memref<1x400xf32, #tpu.memory_space<vmem>>, vector<1x25xf32>,
    %22 = vector.extract_strided_slice %15 {offsets = [3, 0], sizes = [1, 25], strides = [1, 1]} : vector<16x25xf32> to vector<1x25xf32>
    %c0_11 = arith.constant 0 : index
    %c75 = arith.constant 75 : index
    %23 = vector.load %arg11[%c0_11, %c75] : memref<1x400xf32, #tpu.memory_space<vmem>>, vector<1x25xf32>
    tpu.vector_store %arg11[%c0_11, %c75], %22 {strides = array<i32>} : memref<1x400xf32, #tpu.memory_space<vmem>>, vector<1x25xf32>,
    %24 = vector.extract_strided_slice %15 {offsets = [4, 0], sizes = [1, 25], strides = [1, 1]} : vector<16x25xf32> to vector<1x25xf32>
    %c0_12 = arith.constant 0 : index
    %c100 = arith.constant 100 : index
    %25 = vector.load %arg11[%c0_12, %c100] : memref<1x400xf32, #tpu.memory_space<vmem>>, vector<1x25xf32>
    tpu.vector_store %arg11[%c0_12, %c100], %24 {strides = array<i32>} : memref<1x400xf32, #tpu.memory_space<vmem>>, vector<1x25xf32>,
    %26 = vector.extract_strided_slice %15 {offsets = [5, 0], sizes = [1, 25], strides = [1, 1]} : vector<16x25xf32> to vector<1x25xf32>
    %c0_13 = arith.constant 0 : index
    %c125 = arith.constant 125 : index
    %27 = vector.load %arg11[%c0_13, %c125] : memref<1x400xf32, #tpu.memory_space<vmem>>, vector<1x25xf32>
    tpu.vector_store %arg11[%c0_13, %c125], %26 {strides = array<i32>} : memref<1x400xf32, #tpu.memory_space<vmem>>, vector<1x25xf32>,
    %28 = vector.extract_strided_slice %15 {offsets = [6, 0], sizes = [1, 25], strides = [1, 1]} : vector<16x25xf32> to vector<1x25xf32>
    %c0_14 = arith.constant 0 : index
    %c150 = arith.constant 150 : index
    %29 = vector.load %arg11[%c0_14, %c150] : memref<1x400xf32, #tpu.memory_space<vmem>>, vector<1x25xf32>
    tpu.vector_store %arg11[%c0_14, %c150], %28 {strides = array<i32>} : memref<1x400xf32, #tpu.memory_space<vmem>>, vector<1x25xf32>,
    %30 = vector.extract_strided_slice %15 {offsets = [7, 0], sizes = [1, 25], strides = [1, 1]} : vector<16x25xf32> to vector<1x25xf32>
    %c0_15 = arith.constant 0 : index
    %c175 = arith.constant 175 : index
    %31 = vector.load %arg11[%c0_15, %c175] : memref<1x400xf32, #tpu.memory_space<vmem>>, vector<1x25xf32>
    tpu.vector_store %arg11[%c0_15, %c175], %30 {strides = array<i32>} : memref<1x400xf32, #tpu.memory_space<vmem>>, vector<1x25xf32>,
    %32 = vector.extract_strided_slice %15 {offsets = [8, 0], sizes = [1, 25], strides = [1, 1]} : vector<16x25xf32> to vector<1x25xf32>
    %c0_16 = arith.constant 0 : index
    %c200 = arith.constant 200 : index
    %33 = vector.load %arg11[%c0_16, %c200] : memref<1x400xf32, #tpu.memory_space<vmem>>, vector<1x25xf32>
    tpu.vector_store %arg11[%c0_16, %c200], %32 {strides = array<i32>} : memref<1x400xf32, #tpu.memory_space<vmem>>, vector<1x25xf32>,
    %34 = vector.extract_strided_slice %15 {offsets = [9, 0], sizes = [1, 25], strides = [1, 1]} : vector<16x25xf32> to vector<1x25xf32>
    %c0_17 = arith.constant 0 : index
    %c225 = arith.constant 225 : index
    %35 = vector.load %arg11[%c0_17, %c225] : memref<1x400xf32, #tpu.memory_space<vmem>>, vector<1x25xf32>
    tpu.vector_store %arg11[%c0_17, %c225], %34 {strides = array<i32>} : memref<1x400xf32, #tpu.memory_space<vmem>>, vector<1x25xf32>,
    %36 = vector.extract_strided_slice %15 {offsets = [10, 0], sizes = [1, 25], strides = [1, 1]} : vector<16x25xf32> to vector<1x25xf32>
    %c0_18 = arith.constant 0 : index
    %c250 = arith.constant 250 : index
    %37 = vector.load %arg11[%c0_18, %c250] : memref<1x400xf32, #tpu.memory_space<vmem>>, vector<1x25xf32>
    tpu.vector_store %arg11[%c0_18, %c250], %36 {strides = array<i32>} : memref<1x400xf32, #tpu.memory_space<vmem>>, vector<1x25xf32>,
    %38 = vector.extract_strided_slice %15 {offsets = [11, 0], sizes = [1, 25], strides = [1, 1]} : vector<16x25xf32> to vector<1x25xf32>
    %c0_19 = arith.constant 0 : index
    %c275 = arith.constant 275 : index
    %39 = vector.load %arg11[%c0_19, %c275] : memref<1x400xf32, #tpu.memory_space<vmem>>, vector<1x25xf32>
    tpu.vector_store %arg11[%c0_19, %c275], %38 {strides = array<i32>} : memref<1x400xf32, #tpu.memory_space<vmem>>, vector<1x25xf32>,
    %40 = vector.extract_strided_slice %15 {offsets = [12, 0], sizes = [1, 25], strides = [1, 1]} : vector<16x25xf32> to vector<1x25xf32>
    %c0_20 = arith.constant 0 : index
    %c300 = arith.constant 300 : index
    %41 = vector.load %arg11[%c0_20, %c300] : memref<1x400xf32, #tpu.memory_space<vmem>>, vector<1x25xf32>
    tpu.vector_store %arg11[%c0_20, %c300], %40 {strides = array<i32>} : memref<1x400xf32, #tpu.memory_space<vmem>>, vector<1x25xf32>,
    %42 = vector.extract_strided_slice %15 {offsets = [13, 0], sizes = [1, 25], strides = [1, 1]} : vector<16x25xf32> to vector<1x25xf32>
    %c0_21 = arith.constant 0 : index
    %c325 = arith.constant 325 : index
    %43 = vector.load %arg11[%c0_21, %c325] : memref<1x400xf32, #tpu.memory_space<vmem>>, vector<1x25xf32>
    tpu.vector_store %arg11[%c0_21, %c325], %42 {strides = array<i32>} : memref<1x400xf32, #tpu.memory_space<vmem>>, vector<1x25xf32>,
    %44 = vector.extract_strided_slice %15 {offsets = [14, 0], sizes = [1, 25], strides = [1, 1]} : vector<16x25xf32> to vector<1x25xf32>
    %c0_22 = arith.constant 0 : index
    %c350 = arith.constant 350 : index
    %45 = vector.load %arg11[%c0_22, %c350] : memref<1x400xf32, #tpu.memory_space<vmem>>, vector<1x25xf32>
    tpu.vector_store %arg11[%c0_22, %c350], %44 {strides = array<i32>} : memref<1x400xf32, #tpu.memory_space<vmem>>, vector<1x25xf32>,
    %46 = vector.extract_strided_slice %15 {offsets = [15, 0], sizes = [1, 25], strides = [1, 1]} : vector<16x25xf32> to vector<1x25xf32>
    %c0_23 = arith.constant 0 : index
    %c375 = arith.constant 375 : index
    %47 = vector.load %arg11[%c0_23, %c375] : memref<1x400xf32, #tpu.memory_space<vmem>>, vector<1x25xf32>
    tpu.vector_store %arg11[%c0_23, %c375], %46 {strides = array<i32>} : memref<1x400xf32, #tpu.memory_space<vmem>>, vector<1x25xf32>,
    %c0_24 = arith.constant 0 : index
    %c0_25 = arith.constant 0 : index
    %48 = vector.load %arg11[%c0_24, %c0_25] : memref<1x400xf32, #tpu.memory_space<vmem>>, vector<1x400xf32>
    %c0_26 = arith.constant 0 : index
    %c0_27 = arith.constant 0 : index
    %49 = vector.load %arg4[%c0_26, %c0_27] : memref<400x120xf32, #tpu.memory_space<vmem>>, vector<400x120xf32>
    %cst_28 = arith.constant dense<0.000000e+00> : vector<1x120xf32>
    %50 = tpu.matmul %48, %49, %cst_28 {dimension_numbers = #tpu.dot_dimension_numbers<[1], [0], [0], [1], [0, 0, 1, 1], [], []>} : vector<1x400xf32>, vector<400x120xf32>, vector<1x120xf32> -> vector<1x120xf32>
    %c0_29 = arith.constant 0 : index
    %c0_30 = arith.constant 0 : index
    %51 = vector.load %arg5[%c0_29, %c0_30] : memref<1x120xf32, #tpu.memory_space<vmem>>, vector<1x120xf32>
    %52 = arith.addf %50, %51 : vector<1x120xf32>
    %cst_31 = arith.constant 0.000000e+00 : f32
    %53 = vector.broadcast %cst_31 : f32 to vector<1x120xf32>
    %54 = arith.maximumf %52, %53 : vector<1x120xf32>
    %c0_32 = arith.constant 0 : index
    %c0_33 = arith.constant 0 : index
    %55 = vector.load %arg6[%c0_32, %c0_33] : memref<120x84xf32, #tpu.memory_space<vmem>>, vector<120x84xf32>
    %cst_34 = arith.constant dense<0.000000e+00> : vector<1x84xf32>
    %56 = tpu.matmul %54, %55, %cst_34 {dimension_numbers = #tpu.dot_dimension_numbers<[1], [0], [0], [1], [0, 0, 1, 1], [], []>} : vector<1x120xf32>, vector<120x84xf32>, vector<1x84xf32> -> vector<1x84xf32>
    %c0_35 = arith.constant 0 : index
    %c0_36 = arith.constant 0 : index
    %57 = vector.load %arg7[%c0_35, %c0_36] : memref<1x84xf32, #tpu.memory_space<vmem>>, vector<1x84xf32>
    %58 = arith.addf %56, %57 : vector<1x84xf32>
    %cst_37 = arith.constant 0.000000e+00 : f32
    %59 = vector.broadcast %cst_37 : f32 to vector<1x84xf32>
    %60 = arith.maximumf %58, %59 : vector<1x84xf32>
    %c0_38 = arith.constant 0 : index
    %c0_39 = arith.constant 0 : index
    %61 = vector.load %arg8[%c0_38, %c0_39] : memref<84x10xf32, #tpu.memory_space<vmem>>, vector<84x10xf32>
    %cst_40 = arith.constant dense<0.000000e+00> : vector<1x10xf32>
    %62 = tpu.matmul %60, %61, %cst_40 {dimension_numbers = #tpu.dot_dimension_numbers<[1], [0], [0], [1], [0, 0, 1, 1], [], []>} : vector<1x84xf32>, vector<84x10xf32>, vector<1x10xf32> -> vector<1x10xf32>
    %c0_41 = arith.constant 0 : index
    %c0_42 = arith.constant 0 : index
    %63 = vector.load %arg9[%c0_41, %c0_42] : memref<1x10xf32, #tpu.memory_space<vmem>>, vector<1x10xf32>
    %64 = arith.addf %62, %63 : vector<1x10xf32>
    %c0_43 = arith.constant 0 : index
    %c0_44 = arith.constant 0 : index
    %c0_45 = arith.constant 0 : index
    %65 = vector.load %arg10[%c0_43, %c0_44, %c0_45] : memref<1x1x10xf32, #tpu.memory_space<vmem>>, vector<1x1x10xf32>
    %66 = vector.shape_cast %65 : vector<1x1x10xf32> to vector<1x10xf32>
    %67 = vector.shape_cast %64 : vector<1x10xf32> to vector<1x1x10xf32>
    tpu.vector_store %arg10[%c0_43, %c0_44, %c0_45], %67 {strides = array<i32>} : memref<1x1x10xf32, #tpu.memory_space<vmem>>, vector<1x1x10xf32>,
    return
  }
  func.func @transform_0(%arg0: i32) -> (i32, i32, i32) {
    %c0_i32 = arith.constant 0 : i32
    %c0_i32_0 = arith.constant 0 : i32
    %c0_i32_1 = arith.constant 0 : i32
    return %arg0, %c0_i32, %c0_i32_0 : i32, i32, i32
  }
  func.func @transform_1(%arg0: i32) -> (i32, i32) {
    %c0_i32 = arith.constant 0 : i32
    %c0_i32_0 = arith.constant 0 : i32
    %c0_i32_1 = arith.constant 0 : i32
    return %c0_i32, %c0_i32_0 : i32, i32
  }
  func.func @transform_2(%arg0: i32) -> (i32, i32) {
    %c0_i32 = arith.constant 0 : i32
    %c0_i32_0 = arith.constant 0 : i32
    %c0_i32_1 = arith.constant 0 : i32
    return %c0_i32, %c0_i32_0 : i32, i32
  }
  func.func @transform_3(%arg0: i32) -> (i32, i32) {
    %c0_i32 = arith.constant 0 : i32
    %c0_i32_0 = arith.constant 0 : i32
    %c0_i32_1 = arith.constant 0 : i32
    return %c0_i32, %c0_i32_0 : i32, i32
  }
  func.func @transform_4(%arg0: i32) -> (i32, i32) {
    %c0_i32 = arith.constant 0 : i32
    %c0_i32_0 = arith.constant 0 : i32
    %c0_i32_1 = arith.constant 0 : i32
    return %c0_i32, %c0_i32_0 : i32, i32
  }
  func.func @transform_5(%arg0: i32) -> (i32, i32) {
    %c0_i32 = arith.constant 0 : i32
    %c0_i32_0 = arith.constant 0 : i32
    %c0_i32_1 = arith.constant 0 : i32
    return %c0_i32, %c0_i32_0 : i32, i32
  }
  func.func @transform_6(%arg0: i32) -> (i32, i32) {
    %c0_i32 = arith.constant 0 : i32
    %c0_i32_0 = arith.constant 0 : i32
    %c0_i32_1 = arith.constant 0 : i32
    return %c0_i32, %c0_i32_0 : i32, i32
  }
  func.func @transform_7(%arg0: i32) -> (i32, i32) {
    %c0_i32 = arith.constant 0 : i32
    %c0_i32_0 = arith.constant 0 : i32
    %c0_i32_1 = arith.constant 0 : i32
    return %c0_i32, %c0_i32_0 : i32, i32
  }
  func.func @transform_8(%arg0: i32) -> (i32, i32) {
    %c0_i32 = arith.constant 0 : i32
    %c0_i32_0 = arith.constant 0 : i32
    %c0_i32_1 = arith.constant 0 : i32
    return %c0_i32, %c0_i32_0 : i32, i32
  }
  func.func @transform_9(%arg0: i32) -> (i32, i32, i32) {
    %c0_i32 = arith.constant 0 : i32
    %c0_i32_0 = arith.constant 0 : i32
    %c0_i32_1 = arith.constant 0 : i32
    return %arg0, %c0_i32, %c0_i32_0 : i32, i32, i32
  }
}

</mosaic_0001>

<bundles_post_ra>
// kernel: net_forward.2
= control target key start
LH: loop header
LB: loop body
LE: loop exit
PB: predicated region body
PF: predicated region fallthrough
CT: control target
= control target key end

     0   :  { %s769_s12 = smov 0   ;;  %s903_s0 = inlined_call_operand.vmem [shape: f32[2,75,784], index: 0, kind: input, shape index: {}]   ;;  %s904_s1 = inlined_call_operand.vmem [shape: f32[6,75], index: 1, kind: input, shape index: {}]   ;;  %s905_s2 = inlined_call_operand.vmem [shape: f32[6,1], index: 2, kind: input, shape index: {}]   ;;  %s906_s3 = inlined_call_operand.vmem [shape: f32[2,6,196], index: 3, kind: output, shape index: {}]  }
   0x1 LB: > { %s665_s13 = sadd.s32 4294967295, %s742_s12   ;;  %p669_p0 = scmp.ge.s32.totalorder %s742_s12, 1  ;;  %s742_s12 = sphi %s769_s12, %s13_s12  }
   0x2   : > { %p137_p1 = scmp.lt.s32.totalorder %s742_s12, 3 }
   0x4   : > { %p138_p2 = pnand %p669_p0, %p137_p1 }
   0x5   : > { %p161_p3 = scmp.lt.s32.totalorder (!%p138_p2), %s665_s13, 1  ;;  %s747_s22 = smov (!%p138_p2), 60  }
   0x6   : > { %141 = sbr.rel (%p138_p2) target bundleno = 497 (0x1f1), region = 32  ;;  %s748_s23 = smov (!%p138_p2), 120  }
   0xb   : > { %v744_v0 = vmov 0.0   ;;  %v242_v1 = vld [vmem:[%s905_s2] sm:$0x3f]  ;;  %s908_s13 = smov (!%p161_p3, %s665_s13), 1  ;;  %v745_v2 = vmov 0   ;;  %vm252_vm0 = vcmask 1042432  }
   0xc   : > { %338 = vmatprep.mubr.f32.mxu0 %v744_v0  ;;  %409 = vmatprep.mubr.f32.mxu1 %v744_v0  ;;  %s721_s16 = smul.u32 560, %s908_s13  ;;  %v836_v42 = vld [vmem:[%s904_s1] sm:$0x3f]  ;;  %vm248_vm1 = vcmask 613376   ;;  %vm746_vm2 = vmmov 0   ;;  %vm573_vm3 = vcmask 490496  }
   0xd   : > { %735 = vset.pattern.permute.xlu0 %v745_v2  ;;  %s686_s24 = sshll.u32 %s908_s13, 4  ;;  %vm601_vm4 = vcmask 982016   ;;  %vm608_vm5 = vcmask 553984  }
   0xe   : > { %245 = vperm.xlu0 %735, %v242_v1   ;;  %s788_s19 = scalar_lea.vmem %s903_s0, %s721_s16  ;;  %s170_s27 = scalar_lea.vmem %s906_s3, %s686_s24 }
   0xf   : > { %v236_v3 = vld [vmem:[%s788_s19 + $0x200] sm:$0x7]  ;;  %v235_v4 = vld [vmem:[%s788_s19 + $0x1f8] sm:$0x7]  ;;  %v229_v5 = vld [vmem:[%s788_s19 + $0x1c8] sm:$0xff] }
  0x10   : > { %673 = vmatprep.subr.msk.mxu0 %vm252_vm0, %v236_v3  ;;  %v238_v6 = vld [vmem:[%s788_s19 + $0x210] sm:$0x7]  ;;  %v228_v7 = vld [vmem:[%s788_s19 + $0x1c0] sm:$0xff]  ;;  %v237_v8 = vld [vmem:[%s788_s19 + $0x208] sm:$0x7] }
  0x11   : > { %674 = vmatpush1.msk.msra.mxu0 %vm252_vm0, %v235_v4  ;;  %676 = vmatprep.subr.msk.mxu1 %vm252_vm0, %v238_v6  ;;  %v222_v9 = vld [vmem:[%s788_s19 + $0x190] sm:$0xff]  ;;  %v231_v10 = vld [vmem:[%s788_s19 + $0x1d8] sm:$0xff]  ;;  %v221_v11 = vld [vmem:[%s788_s19 + $0x188] sm:$0xff] }
  0x12   : > { %288 = vmatprep.subr.mxu0 %v229_v5  ;;  %677 = vmatpush1.msk.msra.mxu1 %vm252_vm0, %v237_v8  ;;  %v230_v12 = vld [vmem:[%s788_s19 + $0x1d0] sm:$0xff]  ;;  %v224_v13 = vld [vmem:[%s788_s19 + $0x1a0] sm:$0xff]  ;;  %v215_v14 = vld [vmem:[%s788_s19 + $0x158] sm:$0xff] }
  0x13   : > { %289 = vmatpush1.msra.mxu0 %v228_v7  ;;  %359 = vmatprep.subr.mxu1 %v231_v10  ;;  %v223_v15 = vld [vmem:[%s788_s19 + $0x198] sm:$0xff]  ;;  %v214_v16 = vld [vmem:[%s788_s19 + $0x150] sm:$0xff]  ;;  %v217_v17 = vld [vmem:[%s788_s19 + $0x168] sm:$0xff] }
  0x14   : > { %290 = vmatprep.subr.mxu0 %v222_v9  ;;  %360 = vmatpush1.msra.mxu1 %v230_v12  ;;  %v208_v18 = vld [vmem:[%s788_s19 + $0x120] sm:$0xff]  ;;  %v207_v20 = vld [vmem:[%s788_s19 + $0x118] sm:$0xff]  ;;  %v210_v21 = vld [vmem:[%s788_s19 + $0x130] sm:$0xff] }
  0x15   : > { %291 = vmatpush1.msra.mxu0 %v221_v11  ;;  %361 = vmatprep.subr.mxu1 %v224_v13  ;;  %v216_v19 = vld [vmem:[%s788_s19 + $0x160] sm:$0xff]  ;;  %v201_v22 = vld [vmem:[%s788_s19 + $0xe8] sm:$0xff]  ;;  %v203_v25 = vld [vmem:[%s788_s19 + $0xf8] sm:$0xff] }
  0x16   : > { %292 = vmatprep.subr.mxu0 %v215_v14  ;;  %362 = vmatpush1.msra.mxu1 %v223_v15  ;;  %v209_v23 = vld [vmem:[%s788_s19 + $0x128] sm:$0xff]  ;;  %v200_v24 = vld [vmem:[%s788_s19 + $0xe0] sm:$0xff]  ;;  %v194_v26 = vld [vmem:[%s788_s19 + $0xb0] sm:$0xff] }
  0x17   : > { %293 = vmatpush1.msra.mxu0 %v214_v16  ;;  %363 = vmatprep.subr.mxu1 %v217_v17  ;;  %v202_v27 = vld [vmem:[%s788_s19 + $0xf0] sm:$0xff]  ;;  %v193_v28 = vld [vmem:[%s788_s19 + $0xa8] sm:$0xff]  ;;  %v196_v29 = vld [vmem:[%s788_s19 + $0xc0] sm:$0xff] }
  0x18   : > { %294 = vmatprep.subr.mxu0 %v208_v18  ;;  %364 = vmatpush1.msra.mxu1 %v216_v19  ;;  %v187_v30 = vld [vmem:[%s788_s19 + $0x78] sm:$0xff]  ;;  %v186_v32 = vld [vmem:[%s788_s19 + $0x70] sm:$0xff]  ;;  %v189_v33 = vld [vmem:[%s788_s19 + $0x88] sm:$0xff] }
  0x19   : > { %295 = vmatpush1.msra.mxu0 %v207_v20  ;;  %365 = vmatprep.subr.mxu1 %v210_v21  ;;  %v195_v31 = vld [vmem:[%s788_s19 + $0xb8] sm:$0xff]  ;;  %v180_v34 = vld [vmem:[%s788_s19 + $0x40] sm:$0xff]  ;;  %v182_v37 = vld [vmem:[%s788_s19 + $0x50] sm:$0xff] }
  0x1a   : > { %296 = vmatprep.subr.mxu0 %v201_v22  ;;  %366 = vmatpush1.msra.mxu1 %v209_v23  ;;  %v188_v35 = vld [vmem:[%s788_s19 + $0x80] sm:$0xff]  ;;  %v179_v36 = vld [vmem:[%s788_s19 + $0x38] sm:$0xff]  ;;  %v173_v38 = vld [vmem:[%s788_s19 + $0x8] sm:$0xff] }
  0x1b   : > { %297 = vmatpush1.msra.mxu0 %v200_v24  ;;  %367 = vmatprep.subr.mxu1 %v203_v25  ;;  %v181_v39 = vld [vmem:[%s788_s19 + $0x48] sm:$0xff]  ;;  %v172_v40 = vld [vmem:[%s788_s19] sm:$0xff]  ;;  %v175_v41 = vld [vmem:[%s788_s19 + $0x18] sm:$0xff] }
  0x1c   : > { %298 = vmatprep.subr.mxu0 %v194_v26  ;;  %368 = vmatpush1.msra.mxu1 %v202_v27  ;;  %v240_v43 = vld [vmem:[%s788_s19 + $0x220] sm:$0x7]  ;;  %v174_v44 = vld [vmem:[%s788_s19 + $0x10] sm:$0xff]  ;;  %v239_v45 = vld [vmem:[%s788_s19 + $0x218] sm:$0x7] }
  0x1d   : > { %299 = vmatpush1.msra.mxu0 %v193_v28  ;;  %369 = vmatprep.subr.mxu1 %v196_v29  ;;  %v233_v46 = vld [vmem:[%s788_s19 + $0x1e8] sm:$0xff]  ;;  %v232_v47 = vld [vmem:[%s788_s19 + $0x1e0] sm:$0xff]  ;;  %v226_v49 = vld [vmem:[%s788_s19 + $0x1b0] sm:$0xff] }
  0x1e   : > { %300 = vmatprep.subr.mxu0 %v187_v30  ;;  %370 = vmatpush1.msra.mxu1 %v195_v31  ;;  %v241_v48 = vld [vmem:[%s788_s19 + $0x228] sm:$0x7]  ;;  %v234_v51 = vld [vmem:[%s788_s19 + $0x1f0] sm:$0xff]  ;;  %v219_v52 = vld [vmem:[%s788_s19 + $0x178] sm:$0xff] }
  0x1f   : > { %301 = vmatpush1.msra.mxu0 %v186_v32  ;;  %371 = vmatprep.subr.mxu1 %v189_v33  ;;  %v225_v50 = vld [vmem:[%s788_s19 + $0x1a8] sm:$0xff]  ;;  %v218_v53 = vld [vmem:[%s788_s19 + $0x170] sm:$0xff]  ;;  %v227_v54 = vld [vmem:[%s788_s19 + $0x1b8] sm:$0xff] }
  0x20   : > { %302 = vmatprep.subr.mxu0 %v180_v34  ;;  %372 = vmatpush1.msra.mxu1 %v188_v35  ;;  %v212_v55 = vld [vmem:[%s788_s19 + $0x140] sm:$0xff]  ;;  %v211_v56 = vld [vmem:[%s788_s19 + $0x138] sm:$0xff]  ;;  %v205_v58 = vld [vmem:[%s788_s19 + $0x108] sm:$0xff] }
  0x21   : > { %303 = vmatpush1.msra.mxu0 %v179_v36  ;;  %373 = vmatprep.subr.mxu1 %v182_v37  ;;  %v220_v57 = vld [vmem:[%s788_s19 + $0x180] sm:$0xff]  ;;  %v213_v60 = vld [vmem:[%s788_s19 + $0x148] sm:$0xff]  ;;  %v198_v61 = vld [vmem:[%s788_s19 + $0xd0] sm:$0xff] }
  0x22   : > { %304 = vmatprep.subr.mxu0 %v173_v38  ;;  %374 = vmatpush1.msra.mxu1 %v181_v39  ;;  %v204_v59 = vld [vmem:[%s788_s19 + $0x100] sm:$0xff]  ;;  %v197_v62 = vld [vmem:[%s788_s19 + $0xc8] sm:$0xff]  ;;  %v206_v63 = vld [vmem:[%s788_s19 + $0x110] sm:$0xff] }
  0x23   : > { %305 = vmatpush1.msra.mxu0 %v172_v40  ;;  %375 = vmatprep.subr.mxu1 %v175_v41  ;;  %v191_v1 = vld [vmem:[%s788_s19 + $0x98] sm:$0xff]  ;;  %v190_v2 = vld [vmem:[%s788_s19 + $0x90] sm:$0xff]  ;;  %v184_v4 = vld [vmem:[%s788_s19 + $0x60] sm:$0xff] }
  0x24   : > { %675 = vmatmul.mubr.msk.f32.vlgmr.msra.gmra.mxu0 %vm248_vm1, %v836_v42  ;;  %679 = vmatprep.subr.msk.mxu0 %vm252_vm0, %v240_v43  ;;  %v199_v3 = vld [vmem:[%s788_s19 + $0xd8] sm:$0xff]  ;;  %v192_v6 = vld [vmem:[%s788_s19 + $0xa0] sm:$0xff]  ;;  %v177_v7 = vld [vmem:[%s788_s19 + $0x28] sm:$0xff] }
  0x25   : > { %376 = vmatpush1.msra.mxu1 %v174_v44  ;;  %680 = vmatpush1.msk.msra.mxu0 %vm252_vm0, %v239_v45  ;;  %v183_v5 = vld [vmem:[%s788_s19 + $0x58] sm:$0xff]  ;;  %v176_v8 = vld [vmem:[%s788_s19 + $0x20] sm:$0xff]  ;;  %v185_v9 = vld [vmem:[%s788_s19 + $0x68] sm:$0xff] }
  0x26   : > { %430 = vmatprep.subr.mxu0 %v233_v46  ;;  %698 = vmatprep.subr.mxu1 %v744_v0  ;;  %v178_v10 = vld [vmem:[%s788_s19 + $0x30] sm:$0xff] }
  0x27   : > { %678 = vmatmul.mubr.msk.f32.vlgmr.msra.gmra.mxu1 %vm248_vm1, %v836_v42  ;;  %431 = vmatpush1.msra.mxu0 %v232_v47 }
  0x28   : > { %699 = vmatpush3.msk.msra.mxu1 %vm252_vm0, %v241_v48  ;;  %432 = vmatprep.subr.mxu0 %v226_v49 }
  0x29   : > { %700 = vmatprep.subr.mxu1 %v744_v0  ;;  %433 = vmatpush1.msra.mxu0 %v225_v50 }
  0x2a   : > { %701 = vmatpush3.msra.mxu1 %v234_v51  ;;  %434 = vmatprep.subr.mxu0 %v219_v52 }
  0x2b   : > { %702 = vmatprep.subr.mxu1 %v744_v0  ;;  %435 = vmatpush1.msra.mxu0 %v218_v53 }
  0x2c   : > { %703 = vmatpush3.msra.mxu1 %v227_v54  ;;  %436 = vmatprep.subr.mxu0 %v212_v55 }
  0x2d   : > { %704 = vmatprep.subr.mxu1 %v744_v0  ;;  %437 = vmatpush1.msra.mxu0 %v211_v56 }
  0x2e   : > { %705 = vmatpush3.msra.mxu1 %v220_v57  ;;  %438 = vmatprep.subr.mxu0 %v205_v58 }
  0x2f   : > { %706 = vmatprep.subr.mxu1 %v744_v0  ;;  %439 = vmatpush1.msra.mxu0 %v204_v59 }
  0x30   : > { %707 = vmatpush3.msra.mxu1 %v213_v60  ;;  %440 = vmatprep.subr.mxu0 %v198_v61 }
  0x31   : > { %708 = vmatprep.subr.mxu1 %v744_v0  ;;  %441 = vmatpush1.msra.mxu0 %v197_v62 }
  0x32   : > { %709 = vmatpush3.msra.mxu1 %v206_v63  ;;  %442 = vmatprep.subr.mxu0 %v191_v1 }
  0x33   : > { %710 = vmatprep.subr.mxu1 %v744_v0  ;;  %443 = vmatpush1.msra.mxu0 %v190_v2 }
  0x34   : > { %711 = vmatpush3.msra.mxu1 %v199_v3  ;;  %444 = vmatprep.subr.mxu0 %v184_v4 }
  0x35   : > { %712 = vmatprep.subr.mxu1 %v744_v0  ;;  %445 = vmatpush1.msra.mxu0 %v183_v5 }
  0x36   : > { %713 = vmatpush3.msra.mxu1 %v192_v6  ;;  %446 = vmatprep.subr.mxu0 %v177_v7 }
  0x37   : > { %714 = vmatprep.subr.mxu1 %v744_v0  ;;  %447 = vmatpush1.msra.mxu0 %v176_v8 }
  0x38   : > { %480 = vmatprep.mubr.f32.mxu0 %v744_v0  ;;  %715 = vmatpush3.msra.mxu1 %v185_v9 }
  0x39   : > { %681 = vmatmul.mubr.msk.f32.vlgmr.msra.gmra.mxu0 %vm248_vm1, %v836_v42  ;;  %716 = vmatprep.subr.mxu1 %v744_v0 }
  0x3a   : > { %717 = vmatpush3.msra.mxu1 %v178_v10  ;;  %718 = vmatprep.mubr.msk.f32.mxu1 %vm746_vm2, %v744_v0 }
  0x3b   : > { %719 = vmatmul.mubr.msk.f32.vlgmr.msra.gmra.mxu1 %vm248_vm1, %v836_v42 }
  0x89   : > { %v246_v14 = vpop.permute.xlu0 %245 }
  0xe4   : > { %v340_v11 = vpop.f32.mrf.mxu0 }
  0xe5   : > { %v341_v36 = vadd.f32 %v340_v11, %v246_v14 }
  0xe6   : > { %v342_v13 = vpop.f32.mrf.mxu0 }
  0xe7   : > { %v411_v12 = vpop.f32.mrf.mxu1  ;;  %v343_v20 = vadd.f32 %v342_v13, %v246_v14  ;;  %v557_v41 = vmax.f32 %v341_v36, 0.0 }
  0xe8   : > { %v412_v27 = vadd.f32 %v411_v12, %v246_v14 }
  0xe9   : > { %v413_v15 = vpop.f32.mrf.mxu1  ;;  %v558_v0 = vmax.f32 %v343_v20, 0.0 }
  0xea   : > { %v414_v26 = vadd.f32 %v413_v15, %v246_v14  ;;  %v559_v30 = vmax.f32 %v412_v27, 0.0 }
  0xec   : > { %v560_v29 = vmax.f32 %v414_v26, 0.0 }
  0xf9   : > { %v482_v16 = vpop.f32.mrf.mxu0 }
  0xfa   : > { %v483_v17 = vadd.f32 %v482_v16, %v246_v14 }
  0xfb   : > { %v484_v18 = vpop.f32.mrf.mxu0  ;;  %v553_v19 = vpop.f32.mrf.mxu1 }
  0xfc   : > { %v561_v21 = vmax.f32 %v483_v17, 0.0  ;;  %v485_v22 = vadd.f32 %v484_v18, %v246_v14  ;;  %v554_v25 = vadd.f32 %v553_v19, %v246_v14 }
  0xfd   : > { %v720_v23 = vpop.f32.mrf.mxu1 }
  0xfe   : > { %v562_v24 = vmax.f32 %v485_v22, 0.0  ;;  %583 = vrot.lane.b32.xlu0 %v561_v21, %s747_s22  ;;  %v563_v28 = vmax.f32 %v554_v25, 0.0 }
 0x100   : > { %585 = vrot.lane.b32.xlu1 %v562_v24, %s747_s22 }
 0x102   : > { %567 = vrot.lane.b32.xlu0 %v558_v0, %s747_s22 }
 0x104   : > { %587 = vrot.lane.b32.xlu1 %v563_v28, %s747_s22 }
 0x106   : > { %571 = vrot.lane.b32.xlu0 %v560_v29, %s747_s22 }
 0x108   : > { %569 = vrot.lane.b32.xlu1 %v559_v30, %s747_s22 }
 0x170   : > { %v584_v31 = vpop.permute.xlu0 %583 }
 0x172   : > { %v586_v32 = vpop.permute.xlu1 %585 }
 0x173   : > { %v589_v33 = vsel %vm573_vm3, %v584_v31, %v586_v32 }
 0x174   : > { %v593_v34 = vmax.f32 %v560_v29, %v589_v33  ;;  %v568_v39 = vpop.permute.xlu0 %567 }
 0x176   : > { %v588_v35 = vpop.permute.xlu1 %587  ;;  %597 = vrot.lane.b32.xlu1 %v593_v34, %s748_s23 }
 0x177   : > { %v590_v37 = vsel %vm573_vm3, %v586_v32, %v588_v35 }
 0x178   : > { %v594_v38 = vmax.f32 %v561_v21, %v590_v37  ;;  %v572_v44 = vpop.permute.xlu0 %571 }
 0x17a   : > { %v570_v40 = vpop.permute.xlu1 %569  ;;  %599 = vrot.lane.b32.xlu0 %v594_v38, %s748_s23 }
 0x17b   : > { %v574_v42 = vsel %vm573_vm3, %v568_v39, %v570_v40  ;;  %v575_v45 = vsel %vm573_vm3, %v570_v40, %v572_v44 }
 0x17c   : > { %v578_v43 = vmax.f32 %v557_v41, %v574_v42  ;;  %v579_v46 = vmax.f32 %v558_v0, %v575_v45 }
 0x1e8   : > { %v598_v47 = vpop.permute.xlu1 %597 }
 0x1ec   : > { %v600_v48 = vpop.permute.xlu0 %599 }
 0x1ed   : > { %v602_v49 = vsel %vm601_vm4, %v598_v47, %v600_v48  ;;  %v606_v50 = vmax.f32 %v579_v46, %v600_v48 }
 0x1ee   : > { %v605_v51 = vmax.f32 %v578_v43, %v602_v49 }
 0x1ef   : > { %609 = vst.msk [vmem:[%s170_s27 + $0x8] sm:$0x3f] %vm608_vm5, %v606_v50 }
 0x1f0   : > { %607 = vst [vmem:[%s170_s27] sm:$0x3f] %v605_v51 }
 0x1f1 PF: > { %s13_s12 = sadd.s32 1, %s742_s12  }
 0x1f2   : > { %p10_p4 = scmp.ge.s32.totalorder %s13_s12, 4  }
 0x1f4   :  { %12 = sbr.rel (!%p10_p4) target bundleno = 1 (0x1), region = 62 }

// kernel: net_forward.3
= control target key start
LH: loop header
LB: loop body
LE: loop exit
PB: predicated region body
PF: predicated region fallthrough
CT: control target
= control target key end

     0   :  { %14 = vsyncpa [#allocation4], 0  ;;  %s2066_s0 = inlined_call_operand.vmem [shape: f32[2,150,100], index: 0, kind: input, shape index: {}]   ;;  %s2067_s1 = inlined_call_operand.vmem [shape: f32[16,150], index: 1, kind: input, shape index: {}]   ;;  %s2068_s2 = inlined_call_operand.vmem [shape: f32[16,1], index: 2, kind: input, shape index: {}]   ;;  %s2069_s3 = inlined_call_operand.vmem [shape: f32[400,120], index: 3, kind: input, shape index: {}]   ;;  %s2070_s4 = inlined_call_operand.vmem [shape: f32[1,120], index: 4, kind: input, shape index: {}]   ;;  %s2071_s5 = inlined_call_operand.vmem [shape: f32[120,84], index: 5, kind: input, shape index: {}]   ;;  %s2072_s6 = inlined_call_operand.vmem [shape: f32[1,84], index: 6, kind: input, shape index: {}]   ;;  %s2073_s7 = inlined_call_operand.vmem [shape: f32[84,10], index: 7, kind: input, shape index: {}]   ;;  %s2074_s8 = inlined_call_operand.vmem [shape: f32[1,10], index: 8, kind: input, shape index: {}]   ;;  %s2075_s9 = inlined_call_operand.hbm [shape: f32[2,1,10], index: 9, kind: output, shape index: {}]  }
   0x1   :  { %16 = vsyncpa [#allocation4 + $0x1], 0  ;;  %s1491_s30 = smov 0   ;;  %s1493_s10 = smov 0  }
   0x2   :  { %s1495_s11 = smov 0   ;;  %s1497_s12 = smov 0  }
   0x3 LB: > { %s1512_s13 = sadd.s32 4294967295, %s1417_s12   ;;  %s1159_s14 = sadd.s32 4294967294, %s1417_s12   ;;  %s1417_s12 = sphi %s1497_s12, %s2109_s12   ;;  %s1413_s11 = sphi %s1495_s11, %s2108_s11   ;;  %s1409_s10 = sphi %s1493_s10, %s2107_s10   ;;  %s1405_s30 = sphi %s1491_s30, %s2106_s30  }
   0x4   : > { %s1516_s15 = sadd.s32 1, %s1417_s12   ;;  %s223_s16 = sadd.s32 1, %s1413_s11 }
   0x5   : > { %s220_s17 = ssub.s32 %s1417_s12, %s1516_s15  ;;  %p233_p0 = scmp.ne.s32.totalorder %s1413_s11, %s1409_s10 }
   0x6   : > { %p221_p1 = scmp.eq.s32.totalorder %s220_s17, 0  ;;  %p234_p2 = scmp.eq.s32.totalorder %s1512_s13, 1 }
   0x7   : > { %p239_p3 = scmp.ne.s32.totalorder %s1409_s10, %s1405_s30  ;;  %p240_p4 = scmp.eq.s32.totalorder %s1159_s14, 1 }
   0x8   : > { %s1527_s18 = scalar_select %p221_p1, %s1413_s11, %s223_s16  }
   0x9   : > { %p1529_p5 = por %p234_p2, %p233_p0  ;;  %p1533_p6 = por %p240_p4, %p239_p3 }
   0xa   : > { %p1162_p7 = scmp.ge.s32.totalorder %s1417_s12, 1  ;;  %p290_p8 = scmp.lt.s32.totalorder %s1417_s12, 3 }
   0xc   : > { %p291_p9 = pnand %p1162_p7, %p290_p8 }
   0xd   : > { %p325_p10 = scmp.lt.s32.totalorder (!%p291_p9), %s1512_s13, 1  ;;  %s1422_s27 = smov (!%p291_p9), 78  }
   0xe   : > { %294 = sbr.rel (%p291_p9) target bundleno = 1292 (0x50c), region = 56  ;;  %s1424_s28 = smov (!%p291_p9), 25  }
   0xf   : > { %s1425_s29 = smov (!%p291_p9), 50   ;;  %s1428_s22 = smov (!%p291_p9), 125  }
  0x10   : > { %s1429_s23 = smov (!%p291_p9), 22   ;;  %s1430_s14 = smov (!%p291_p9), 72  }
  0x13   : > { %v331_v0 = vld [vmem:[%s2067_s1 + $0x8] sm:$0xff]  ;;  %vm365_vm0 = vcmask 179200   ;;  %v1419_v1 = vmov 0.0   ;;  %v353_v2 = vld [vmem:[%s2068_s2] sm:$0xff]  ;;  %s326_s25 = scalar_select %p325_p10, %s1512_s13, 1  ;;  %v1420_v3 = vmov 0   ;;  %v473_v41 = vlaneseq }
  0x14   : > { %376 = vmatprep.subr.mxu0 %v1419_v1  ;;  %1165 = vmatprep.mubr.msk.f32.mxu0 %vm365_vm0, %v331_v0  ;;  %v354_v4 = vld [vmem:[%s2068_s2 + $0x8] sm:$0xff]  ;;  %vm372_vm1 = vcmask 1045504   ;;  %v330_v24 = vld [vmem:[%s2067_s1] sm:$0xff]  ;;  %v333_v25 = vld [vmem:[%s2067_s1 + $0x18] sm:$0xff]  ;;  %v1423_v42 = vmov 1966171168  }
  0x15   : > { %1356 = vset.pattern.permute.xlu0 %v1420_v3  ;;  %s1295_s26 = smul.u32 152, %s326_s25  ;;  %v332_v26 = vld [vmem:[%s2067_s1 + $0x10] sm:$0xff]  ;;  %v480_v43 = vunpack.c.l.s4 %v1423_v42  ;;  %v1606_v45 = vshrl.u32 %v473_v41, 7  ;;  %vm475_vm2 = vcmp.lt.s32.totalorder %v473_v41, 25  ;;  %v724_v49 = vld [vmem:[%s2069_s3 + $0xf8] sm:$0xff]  ;;  %v722_v62 = vld [vmem:[%s2069_s3 + $0xe8] sm:$0xff] }
  0x16   : > { %357 = vperm.xlu0 %1356, %v353_v2   ;;  %1174 = vmatprep.subr.mxu1 %v724_v49  ;;  %v708_v53 = vld [vmem:[%s2069_s3 + $0x78] sm:$0xff]  ;;  %v723_v56 = vld [vmem:[%s2069_s3 + $0xf0] sm:$0xff]  ;;  %v706_v63 = vld [vmem:[%s2069_s3 + $0x68] sm:$0xff]  ;;  %vm504_vm3 = vcmp.ge.s32.totalorder %v473_v41, 25  ;;  %vm505_vm4 = vcmp.lt.s32.totalorder %v473_v41, 50  ;;  %vm512_vm5 = vcmp.ge.s32.totalorder %v473_v41, 50 }
  0x17   : > { %s1555_s16 = scalar_lea.vmem %s2066_s0, %s1295_s26  ;;  %s1421_s26 = smov 103   ;;  %v481_v44 = vunpack.c.0.s8 %v480_v43  ;;  %1175 = vmatpush3.msra.mxu1 %v708_v53  ;;  %v707_v57 = vld [vmem:[%s2069_s3 + $0x70] sm:$0xff]  ;;  %v721_v0 = vld [vmem:[%s2069_s3 + $0xe0] sm:$0xff]  ;;  %v710_v43 = vld [vmem:[%s2069_s3 + $0x88] sm:$0xff]  ;;  %vm513_vm6 = vcmp.lt.s32.totalorder %v473_v41, 75  ;;  %vm520_vm9 = vcmp.ge.s32.totalorder %v473_v41, 75 }
  0x18   : > { %v349_v5 = vld [vmem:[%s1555_s16 + $0x78] sm:$0xff]  ;;  %v348_v6 = vld [vmem:[%s1555_s16 + $0x70] sm:$0xff]  ;;  %v347_v7 = vld [vmem:[%s1555_s16 + $0x68] sm:$0xff]  ;;  %1176 = vmatprep.subr.mxu1 %v723_v56  ;;  %vm521_vm10 = vcmp.lt.s32.totalorder %v473_v41, 100  ;;  %vm542_vm11 = vcmp.ge.s32.totalorder %v473_v41, 100  ;;  %vm543_vm12 = vcmp.lt.s32.totalorder %v473_v41, 125 }
  0x19   : > { %377 = vmatpush1.msra.mxu0 %v349_v5  ;;  %v346_v8 = vld [vmem:[%s1555_s16 + $0x60] sm:$0xff]  ;;  %v345_v9 = vld [vmem:[%s1555_s16 + $0x58] sm:$0xff]  ;;  %v344_v10 = vld [vmem:[%s1555_s16 + $0x50] sm:$0xff]  ;;  %v1609_v46 = vsub.s32 %v481_v44, %v1606_v45  ;;  %1177 = vmatpush3.msra.mxu1 %v707_v57  ;;  %vm560_vm15 = vcmp.ge.s32.totalorder %v473_v41, 125 }
  0x1a   : > { %362 = vperm.xlu0 %1356, %v354_v4   ;;  %378 = vmatprep.subr.mxu0 %v1419_v1  ;;  %v343_v11 = vld [vmem:[%s1555_s16 + $0x48] sm:$0xff]  ;;  %v342_v12 = vld [vmem:[%s1555_s16 + $0x40] sm:$0xff]  ;;  %v341_v13 = vld [vmem:[%s1555_s16 + $0x38] sm:$0xff] }
  0x1b   : > { %379 = vmatpush1.msra.mxu0 %v348_v6  ;;  %v340_v14 = vld [vmem:[%s1555_s16 + $0x30] sm:$0xff]  ;;  %v339_v15 = vld [vmem:[%s1555_s16 + $0x28] sm:$0xff]  ;;  %v338_v16 = vld [vmem:[%s1555_s16 + $0x20] sm:$0xff]  ;;  %1178 = vmatprep.subr.mxu1 %v722_v62 }
  0x1c   : > { %380 = vmatprep.subr.mxu0 %v1419_v1  ;;  %v337_v17 = vld [vmem:[%s1555_s16 + $0x18] sm:$0xff]  ;;  %v336_v18 = vld [vmem:[%s1555_s16 + $0x10] sm:$0xff]  ;;  %v335_v19 = vld [vmem:[%s1555_s16 + $0x8] sm:$0xff]  ;;  %1179 = vmatpush3.msra.mxu1 %v706_v63 }
  0x1d   : > { %381 = vmatpush1.msra.mxu0 %v347_v7  ;;  %v334_v20 = vld [vmem:[%s1555_s16] sm:$0xff]  ;;  %v352_v21 = vld [vmem:[%s1555_s16 + $0x90] sm:$0x3f]  ;;  %v351_v22 = vld [vmem:[%s1555_s16 + $0x88] sm:$0xff]  ;;  %1180 = vmatprep.subr.mxu1 %v721_v0 }
  0x1e   : > { %382 = vmatprep.subr.mxu0 %v1419_v1  ;;  %v350_v23 = vld [vmem:[%s1555_s16 + $0x80] sm:$0xff]  ;;  %v720_v7 = vld [vmem:[%s2069_s3 + $0xd8] sm:$0xff]  ;;  %s1431_s16 = smov 122   ;;  %v695_v42 = vld [vmem:[%s2069_s3 + $0x10] sm:$0xff] }
  0x1f   : > { %383 = vmatpush1.msra.mxu0 %v346_v8  ;;  %v705_v2 = vld [vmem:[%s2069_s3 + $0x60] sm:$0xff]  ;;  %v704_v8 = vld [vmem:[%s2069_s3 + $0x58] sm:$0xff]  ;;  %v694_v44 = vld [vmem:[%s2069_s3 + $0x8] sm:$0xff] }
  0x20   : > { %384 = vmatprep.subr.mxu0 %v1419_v1  ;;  %1181 = vmatpush3.msra.mxu1 %v705_v2  ;;  %vm506_vm7 = vmand %vm504_vm3, %vm505_vm4  ;;  %vm557_vm3 = vcmask 1022976   ;;  %v916_v53 = vld [vmem:[%s2071_s5 + $0x40] sm:$0xff] }
  0x21   : > { %385 = vmatpush1.msra.mxu0 %v345_v9  ;;  %v719_v9 = vld [vmem:[%s2069_s3 + $0xd0] sm:$0xff]  ;;  %1182 = vmatprep.subr.mxu1 %v720_v7  ;;  %vm514_vm8 = vmand %vm512_vm5, %vm513_vm6  ;;  %vm1746_vm6 = vcmp.ge.s32.totalorder %v473_v41, 47  ;;  %v743_v2 = vld [vmem:[%s2070_s4] sm:$0x1] }
  0x22   : > { %386 = vmatprep.subr.mxu0 %v1419_v1  ;;  %1183 = vmatpush3.msra.mxu1 %v704_v8  ;;  %vm522_vm13 = vmand %vm520_vm9, %vm521_vm10  ;;  %vm1761_vm9 = vcmp.lt.s32.totalorder %v473_v41, 97  ;;  %vm1766_vm10 = vcmp.ge.s32.totalorder %v473_v41, 97 }
  0x23   : > { %387 = vmatpush1.msra.mxu0 %v344_v10  ;;  %1184 = vmatprep.subr.mxu1 %v719_v9  ;;  %vm544_vm14 = vmand %vm542_vm11, %vm543_vm12  ;;  %vm1771_vm11 = vcmp.lt.s32.totalorder %v473_v41, 122 }
  0x24   : > { %388 = vmatprep.subr.mxu0 %v1419_v1 }
  0x25   : > { %389 = vmatpush1.msra.mxu0 %v343_v11 }
  0x26   : > { %390 = vmatprep.subr.mxu0 %v1419_v1 }
  0x27   : > { %391 = vmatpush1.msra.mxu0 %v342_v12 }
  0x28   : > { %392 = vmatprep.subr.mxu0 %v1419_v1 }
  0x29   : > { %393 = vmatpush1.msra.mxu0 %v341_v13 }
  0x2a   : > { %394 = vmatprep.subr.mxu0 %v1419_v1 }
  0x2b   : > { %395 = vmatpush1.msra.mxu0 %v340_v14  ;;  %v703_v14 = vld [vmem:[%s2069_s3 + $0x50] sm:$0xff] }
  0x2c   : > { %396 = vmatprep.subr.mxu0 %v1419_v1  ;;  %1185 = vmatpush3.msra.mxu1 %v703_v14 }
  0x2d   : > { %397 = vmatpush1.msra.mxu0 %v339_v15  ;;  %v718_v15 = vld [vmem:[%s2069_s3 + $0xc8] sm:$0xff] }
  0x2e   : > { %398 = vmatprep.subr.mxu0 %v1419_v1  ;;  %1186 = vmatprep.subr.mxu1 %v718_v15 }
  0x2f   : > { %399 = vmatpush1.msra.mxu0 %v338_v16  ;;  %v702_v16 = vld [vmem:[%s2069_s3 + $0x48] sm:$0xff] }
  0x30   : > { %400 = vmatprep.subr.mxu0 %v1419_v1  ;;  %1187 = vmatpush3.msra.mxu1 %v702_v16 }
  0x31   : > { %401 = vmatpush1.msra.mxu0 %v337_v17 }
  0x32   : > { %402 = vmatprep.subr.mxu0 %v1419_v1 }
  0x33   : > { %403 = vmatpush1.msra.mxu0 %v336_v18 }
  0x34   : > { %404 = vmatprep.subr.mxu0 %v1419_v1 }
  0x35   : > { %405 = vmatpush1.msra.mxu0 %v335_v19 }
  0x36   : > { %406 = vmatprep.subr.mxu0 %v1419_v1 }
  0x37   : > { %407 = vmatpush1.msra.mxu0 %v334_v20  ;;  %v717_v20 = vld [vmem:[%s2069_s3 + $0xc0] sm:$0xff] }
  0x38   : > { %434 = vmatprep.subr.mxu0 %v1419_v1  ;;  %1188 = vmatprep.subr.mxu1 %v717_v20  ;;  %v751_v20 = vsub.s32 1, %v1606_v45 }
  0x39   : > { %1164 = vmatpush2.msk.msra.mxu0 %vm372_vm1, %v352_v21  ;;  %v701_v21 = vld [vmem:[%s2069_s3 + $0x40] sm:$0xff]  ;;  %vm1732_vm1 = vcmp.ge.s32.totalorder %v473_v41, 22 }
  0x3a   : > { %436 = vmatprep.subr.mxu0 %v1419_v1  ;;  %1189 = vmatpush3.msra.mxu1 %v701_v21  ;;  %v747_v21 = vsub.s32 0, %v1606_v45 }
  0x3b   : > { %437 = vmatpush2.msra.mxu0 %v351_v22  ;;  %v716_v22 = vld [vmem:[%s2069_s3 + $0xb8] sm:$0xff] }
  0x3c   : > { %438 = vmatprep.subr.mxu0 %v1419_v1  ;;  %1190 = vmatprep.subr.mxu1 %v716_v22  ;;  %v759_v22 = vsub.s32 3, %v1606_v45 }
  0x3d   : > { %439 = vmatpush2.msra.mxu0 %v350_v23 }
  0x3e   : > { %441 = vmatmul.mubr.f32.vlgmr.msra.gmra.mxu0 %v330_v24  ;;  %1237 = vmatprep.subr.mxu0 %v1419_v1 }
  0x3f   : > { %1166 = vmatprep.mubr.msk.f32.mxu0 %vm365_vm0, %v333_v25  ;;  %vm561_vm0 = vcmp.lt.s32.totalorder %v473_v41, 150 }
  0x40   : > { %vm562_vm4 = vmand %vm560_vm15, %vm561_vm0  ;;  %vm1794_vm0 = vcmp.ge.s32.totalorder %v473_v41, 19 }
  0x42   : > { %446 = vmatmul.mubr.f32.gmra.mxu0 %v332_v26  ;;  %v700_v26 = vld [vmem:[%s2069_s3 + $0x38] sm:$0xff] }
  0x43   : > { %1191 = vmatpush3.msra.mxu1 %v700_v26 }
  0x91   : > { %v358_v27 = vpop.permute.xlu0 %357 }
  0x95   : > { %v363_v32 = vpop.permute.xlu0 %362 }
  0xfe   : > { %v442_v28 = vpop.f32.mrf.mxu0 }
  0xff   : > { %v443_v29 = vadd.f32 %v442_v28, %v358_v27  ;;  %v715_v27 = vld [vmem:[%s2069_s3 + $0xb0] sm:$0xff] }
 0x100   : > { %v444_v30 = vpop.f32.mrf.mxu0  ;;  %v699_v28 = vld [vmem:[%s2069_s3 + $0x30] sm:$0xff]  ;;  %1192 = vmatprep.subr.mxu1 %v715_v27 }
 0x101   : > { %v451_v31 = vmax.f32 %v443_v29, 0.0  ;;  %1193 = vmatpush3.msra.mxu1 %v699_v28  ;;  %v739_v27 = vld [vmem:[%s2069_s3 + $0x170] sm:$0xff]  ;;  %v738_v28 = vld [vmem:[%s2069_s3 + $0x168] sm:$0xff] }
 0x102   : > { %v447_v33 = vpop.f32.mrf.mxu0 }
 0x103   : > { %v448_v34 = vadd.f32 %v447_v33, %v363_v32  ;;  %455 = vrot.lane.b32.xlu1 %v451_v31, %s1421_s26  ;;  %v714_v32 = vld [vmem:[%s2069_s3 + $0xa8] sm:$0xff] }
 0x104   : > { %v449_v35 = vpop.f32.mrf.mxu0  ;;  %v698_v33 = vld [vmem:[%s2069_s3 + $0x28] sm:$0xff]  ;;  %1194 = vmatprep.subr.mxu1 %v714_v32 }
 0x105   : > { %v452_v36 = vmax.f32 %v448_v34, 0.0  ;;  %v713_v34 = vld [vmem:[%s2069_s3 + $0xa0] sm:$0xff]  ;;  %1195 = vmatpush3.msra.mxu1 %v698_v33  ;;  %v734_v32 = vld [vmem:[%s2069_s3 + $0x148] sm:$0xff] }
 0x106   : > { %1196 = vmatprep.subr.mxu1 %v713_v34  ;;  %v733_v33 = vld [vmem:[%s2069_s3 + $0x140] sm:$0xff]  ;;  %v732_v34 = vld [vmem:[%s2069_s3 + $0x138] sm:$0xff] }
 0x107   : > { %457 = vrot.lane.b32.xlu1 %v452_v36, %s1421_s26  ;;  %s1426_s26 = smov 100  }
 0x175   : > { %v456_v37 = vpop.permute.xlu1 %455 }
 0x176   : > { %v461_v38 = vmax.f32 %v451_v31, %v456_v37  ;;  %v712_v37 = vld [vmem:[%s2069_s3 + $0x98] sm:$0xff] }
 0x178   : > { %465 = vrot.lane.b32.xlu0 %v461_v38, %s1422_s27 }
 0x179   : > { %v458_v39 = vpop.permute.xlu1 %457 }
 0x17a   : > { %v462_v40 = vmax.f32 %v452_v36, %v458_v39  ;;  %v697_v36 = vld [vmem:[%s2069_s3 + $0x20] sm:$0xff]  ;;  %v711_v39 = vld [vmem:[%s2069_s3 + $0x90] sm:$0xff] }
 0x17b   : > { %1197 = vmatpush3.msra.mxu1 %v697_v36  ;;  %v730_v36 = vld [vmem:[%s2069_s3 + $0x128] sm:$0xff] }
 0x17c   : > { %467 = vrot.lane.b32.xlu1 %v462_v40, %s1422_s27  ;;  %s1427_s27 = smov 75   ;;  %1198 = vmatprep.subr.mxu1 %v712_v37  ;;  %v729_v37 = vld [vmem:[%s2069_s3 + $0x120] sm:$0xff] }
 0x1ea   : > { %v466_v47 = vpop.permute.xlu0 %465 }
 0x1eb   : > { %v471_v48 = vmax.f32 %v461_v38, %v466_v47  ;;  %v696_v38 = vld [vmem:[%s2069_s3 + $0x18] sm:$0xff]  ;;  %v693_v47 = vld [vmem:[%s2069_s3] sm:$0xff] }
 0x1ec   : > { %1199 = vmatpush3.msra.mxu1 %v696_v38  ;;  %v728_v38 = vld [vmem:[%s2069_s3 + $0x118] sm:$0xff] }
 0x1ed   : > { %v485_v50 = vrot.slane %v471_v48, %v1609_v46  ;;  %v524_v51 = vcombine.high %v471_v48, %v471_v48  ;;  %477 = vst.msk [vmem:[#allocation2] sm:$0x1] %vm475_vm2, %v471_v48  ;;  %1200 = vmatprep.subr.mxu1 %v711_v39  ;;  %vm1737_vm2 = vcmp.lt.s32.totalorder %v473_v41, 47  ;;  %v727_v39 = vld [vmem:[%s2069_s3 + $0x110] sm:$0xff] }
 0x1ee   : > { %v468_v52 = vpop.permute.xlu1 %467  ;;  %1201 = vmatpush3.msra.mxu1 %v695_v42  ;;  %vm570_vm5 = vmand %vm1732_vm1, %vm1737_vm2  ;;  %vm1799_vm1 = vcmp.lt.s32.totalorder %v473_v41, 44  ;;  %vm621_vm2 = vcmask 998400   ;;  %v725_v42 = vld [vmem:[%s2069_s3 + $0x100] sm:$0xff] }
 0x1ef   : > { %v486_v54 = vcombine.high %v485_v50, %v485_v50  ;;  %v493_v55 = vrot.slane %v485_v50, %v1609_v46  ;;  %v472_v58 = vmax.f32 %v462_v40, %v468_v52  ;;  %v531_v61 = vrot.slane %v524_v51, %v1609_v46  ;;  %1202 = vmatprep.subr.mxu1 %v710_v43  ;;  %v742_v43 = vld [vmem:[%s2069_s3 + $0x188] sm:$0xff] }
 0x1f0   : > { %1203 = vmatpush3.msra.mxu1 %v694_v44  ;;  %v755_v44 = vsub.s32 2, %v1606_v45  ;;  %v921_v45 = vld [vmem:[%s2071_s5 + $0x68] sm:$0xff] }
 0x1f1   : > { %v500_v59 = vrot.slane %v486_v54, %v1609_v46  ;;  %v508_v60 = vcombine.high %v493_v55, %v493_v55  ;;  %v587_v3 = vrot.slane %v472_v58, %v1609_v46  ;;  %v538_v4 = vrot.slane %v531_v61, %v1609_v46  ;;  %v917_v52 = vld [vmem:[%s2071_s5 + $0x48] sm:$0xff] }
 0x1f2   : > { %v546_v6 = vcombine.high %v531_v61, %v531_v61  ;;  %v636_v10 = vcombine.high %v472_v58, %v472_v58  ;;  %v911_v58 = vld [vmem:[%s2071_s5 + $0x18] sm:$0xff] }
 0x1f3   : > { %501 = vrot.lane.b32.xlu0 %v500_v59, %s1424_s28  ;;  %509 = vrot.lane.b32.xlu1 %v508_v60, %s1425_s29  ;;  %v516_v5 = vcombine.high %v500_v59, %v500_v59  ;;  %v564_v12 = vcombine.high %v538_v4, %v538_v4  ;;  %v594_v13 = vrot.slane %v587_v3, %v1609_v46  ;;  %s1438_s28 = smov 94   ;;  %v910_v59 = vld [vmem:[%s2071_s5 + $0x10] sm:$0xff] }
 0x1f4   : > { %v553_v11 = vrot.slane %v546_v6, %v1609_v46  ;;  %v602_v17 = vcombine.high %v587_v3, %v587_v3  ;;  %v643_v18 = vrot.slane %v636_v10, %v1609_v46  ;;  %v1007_v10 = vld [vmem:[%s2073_s7 + $0x40] sm:$0xff] }
 0x1f5   : > { %v617_v19 = vcombine.high %v594_v13, %v594_v13 }
 0x1f6   : > { %v658_v23 = vcombine.high %v643_v18, %v643_v18  ;;  %v572_v24 = vcombine.high %v553_v11, %v553_v11  ;;  %v609_v25 = vrot.slane %v602_v17, %v1609_v46  ;;  %v650_v30 = vrot.slane %v643_v18, %v1609_v46 }
 0x1f7   : > { %539 = vrot.lane.b32.xlu0 %v538_v4, %s1426_s26  ;;  %517 = vrot.lane.b32.xlu1 %v516_v5, %s1427_s27  ;;  %s1432_s26 = smov 47   ;;  %s1433_s27 = smov 97  }
 0x1f8   : > { %v628_v29 = vcombine.high %v609_v25, %v609_v25  ;;  %v665_v31 = vrot.slane %v658_v23, %v1609_v46  ;;  %v673_v40 = vcombine.high %v650_v30, %v650_v30  ;;  %v709_v46 = vld [vmem:[%s2069_s3 + $0x80] sm:$0xff] }
 0x1f9   : > { %1204 = vmatprep.subr.mxu1 %v709_v46  ;;  %v741_v46 = vld [vmem:[%s2069_s3 + $0x180] sm:$0xff] }
 0x1fa   : > { %v681_v35 = vcombine.high %v665_v31, %v665_v31  ;;  %1205 = vmatpush3.msra.mxu1 %v693_v47 }
 0x1fb   : > { %554 = vrot.lane.b32.xlu0 %v553_v11, %s1428_s22  ;;  %565 = vrot.lane.b32.xlu1 %v564_v12, %s1429_s23  ;;  %s1434_s22 = smov 19   ;;  %s1435_s23 = smov 44   ;;  %v1005_v12 = vld [vmem:[%s2073_s7 + $0x30] sm:$0xff] }
 0x1fc   : > { %837 = vmatprep.subr.mxu1 %v1419_v1 }
 0x1ff   : > { %595 = vrot.lane.b32.xlu0 %v594_v13, %s1430_s14  ;;  %618 = vrot.lane.b32.xlu1 %v617_v19, %s1431_s16  ;;  %s1436_s14 = smov 119   ;;  %s1437_s16 = smov 69  }
 0x203   : > { %573 = vrot.lane.b32.xlu0 %v572_v24, %s1432_s26  ;;  %610 = vrot.lane.b32.xlu1 %v609_v25, %s1433_s27 }
 0x207   : > { %629 = vrot.lane.b32.xlu0 %v628_v29, %s1434_s22  ;;  %651 = vrot.lane.b32.xlu1 %v650_v30, %s1435_s23  ;;  %v737_v29 = vld [vmem:[%s2069_s3 + $0x160] sm:$0xff]  ;;  %v736_v30 = vld [vmem:[%s2069_s3 + $0x158] sm:$0xff]  ;;  %s1171_s22 = sshll.u32 %s1512_s13, 4  ;;  %s1440_s13 = smov [#allocation3]  }
 0x208   : > { %s2031_s27 = scalar_lea.hbm %s2075_s9, %s1171_s22 }
 0x20b   : > { %682 = vrot.lane.b32.xlu0 %v681_v35, %s1436_s14  ;;  %666 = vrot.lane.b32.xlu1 %v665_v31, %s1437_s16  ;;  %v735_v31 = vld [vmem:[%s2069_s3 + $0x150] sm:$0xff]  ;;  %s323_s16 = sand.u32 1, %s1409_s10   ;;  %s1361_s14 = sshll.u32 %s1440_s13, 4  ;;  %s1362_s14 = int_to_ptr.vmem [resolvable:$false] %s1361_s14 }
 0x20c   : > { %v731_v35 = vld [vmem:[%s2069_s3 + $0x130] sm:$0xff]  ;;  %s324_s23 = scalar_lea.vmem [#allocation3], %s323_s16  ;;  %s1363_s17 = scalar_lea.vmem %s1362_s14, 32 }
 0x20d   : > { %s1104_s24 = sshll.u32 %s324_s23, 4  ;;  %s1105_s24 = int_to_ptr.vmem [resolvable:$true] %s1104_s24 }
 0x20e   : > { %s1357_s29 = scalar_lea.vmem %s1105_s24, 16  ;;  %p1364_p0 = scmp.lt.s32.totalorder %s1105_s24, %s1362_s14 }
 0x20f   : > { %674 = vrot.lane.b32.xlu0 %v673_v40, %s1438_s28  ;;  %v726_v40 = vld [vmem:[%s2069_s3 + $0x108] sm:$0xff]  ;;  %s1092_s28 = scalar_lea.sflag [#allocation4], %s323_s16  ;;  %p1358_p11 = scmp.ne.s32.totalorder %s1105_s24, %s1357_s29 }
 0x210   : > { %p1365_p1 = scmp.lt.s32.totalorder %s1363_s17, %s1357_s29 }
 0x211   : > { %p1359_p12 = pnand %p1358_p11, %p1529_p5 }
 0x212   : > { %p1366_p2 = por %p1365_p1, %p1364_p0 }
 0x213   : > { %p1360_p13 = pneg %p1359_p12 }
 0x215   : > { %p1367_p3 = pnand %p1366_p2, %p1360_p13 }
 0x265   : > { %v502_v48 = vpop.permute.xlu0 %501  ;;  %v510_v49 = vpop.permute.xlu1 %509 }
 0x266   : > { %507 = vst.msk [vmem:[#allocation2] sm:$0x1] %vm506_vm7, %v502_v48  ;;  %vm1751_vm7 = vcmp.lt.s32.totalorder %v473_v41, 72  ;;  %v922_v48 = vld [vmem:[%s2071_s5 + $0x70] sm:$0xff] }
 0x267   : > { %515 = vst.msk [vmem:[#allocation2] sm:$0x1] %vm514_vm8, %v510_v49  ;;  %vm1756_vm8 = vcmp.ge.s32.totalorder %v473_v41, 72  ;;  %vm578_vm12 = vmand %vm1746_vm6, %vm1751_vm7  ;;  %1238 = vmatpush3.msra.mxu0 %v922_v48  ;;  %v920_v49 = vld [vmem:[%s2071_s5 + $0x60] sm:$0xff] }
 0x268   : > { %vm600_vm15 = vmand %vm1756_vm8, %vm1761_vm9  ;;  %vm1824_vm9 = vcmp.ge.s32.totalorder %v473_v41, 69  ;;  %1239 = vmatprep.subr.mxu0 %v1419_v1 }
 0x269   : > { %v540_v50 = vpop.permute.xlu0 %539  ;;  %v518_v51 = vpop.permute.xlu1 %517  ;;  %vm634_vm7 = vmand %vm1794_vm0, %vm1799_vm1  ;;  %vm685_vm0 = vcmask 973824   ;;  %1240 = vmatpush3.msra.mxu0 %v921_v45 }
 0x26a   : > { %523 = vst.msk [vmem:[#allocation2] sm:$0x1] %vm522_vm13, %v518_v51  ;;  %vm1780_vm13 = vcmp.ge.s32.totalorder %v473_v41, 122  ;;  %1241 = vmatprep.subr.mxu0 %v1419_v1  ;;  %v918_v51 = vld [vmem:[%s2071_s5 + $0x50] sm:$0xff] }
 0x26b   : > { %545 = vst.msk [vmem:[#allocation2] sm:$0x1] %vm544_vm14, %v540_v50  ;;  %vm1785_vm14 = vcmp.lt.s32.totalorder %v473_v41, 147  ;;  %v919_v50 = vld [vmem:[%s2071_s5 + $0x58] sm:$0xff]  ;;  %1242 = vmatpush3.msra.mxu0 %v920_v49 }
 0x26c   : > { %vm626_vm6 = vmand %vm1780_vm13, %vm1785_vm14  ;;  %vm678_vm13 = vcmp.lt.s32.totalorder %v473_v41, 119  ;;  %vm688_vm14 = vcmp.ge.s32.totalorder %v473_v41, 119  ;;  %1243 = vmatprep.subr.mxu0 %v1419_v1 }
 0x26d   : > { %v555_v54 = vpop.permute.xlu0 %554  ;;  %v566_v55 = vpop.permute.xlu1 %565  ;;  %1244 = vmatpush3.msra.mxu0 %v919_v50 }
 0x26e   : > { %v556_v56 = vrot.slane %v555_v54, 7  ;;  %1245 = vmatprep.subr.mxu0 %v1419_v1 }
 0x26f   : > { %1246 = vmatpush3.msra.mxu0 %v918_v51 }
 0x270   : > { %v558_v57 = vsel %vm557_vm3, %v556_v56, %v555_v54  ;;  %vm615_vm3 = vmand %vm1766_vm10, %vm1771_vm11  ;;  %vm670_vm10 = vcmp.lt.s32.totalorder %v473_v41, 94  ;;  %1247 = vmatprep.subr.mxu0 %v1419_v1  ;;  %v915_v54 = vld [vmem:[%s2071_s5 + $0x38] sm:$0xff]  ;;  %v913_v56 = vld [vmem:[%s2071_s5 + $0x28] sm:$0xff] }
 0x271   : > { %563 = vst.msk [vmem:[#allocation2] sm:$0x3] %vm562_vm4, %v558_v57  ;;  %v596_v60 = vpop.permute.xlu0 %595  ;;  %v619_v61 = vpop.permute.xlu1 %618  ;;  %vm1808_vm4 = vcmp.ge.s32.totalorder %v473_v41, 44  ;;  %vm671_vm11 = vmand %vm1824_vm9, %vm670_vm10  ;;  %1248 = vmatpush3.msra.mxu0 %v917_v52  ;;  %v912_v57 = vld [vmem:[%s2071_s5 + $0x20] sm:$0xff] }
 0x272   : > { %571 = vst.msk [vmem:[#allocation2 + $0x1] sm:$0x1] %vm570_vm5, %v566_v55  ;;  %v620_v5 = vrot.slane %v619_v61, 7  ;;  %vm655_vm5 = vcmp.lt.s32.totalorder %v473_v41, 69  ;;  %1249 = vmatprep.subr.mxu0 %v1419_v1  ;;  %v914_v55 = vld [vmem:[%s2071_s5 + $0x30] sm:$0xff] }
 0x273   : > { %vm656_vm8 = vmand %vm1808_vm4, %vm655_vm5  ;;  %1250 = vmatpush3.msra.mxu0 %v916_v53  ;;  %vm1439_vm4 = vmmov 0   ;;  %vm924_vm5 = vcmask 982016  }
 0x274   : > { %v622_v11 = vsel %vm621_vm2, %v620_v5, %v619_v61  ;;  %1251 = vmatprep.subr.mxu0 %v1419_v1  ;;  %v908_v61 = vld [vmem:[%s2071_s5] sm:$0xff]  ;;  %1267 = vmatprep.mubr.msk.f32.mxu0 %vm1439_vm4, %v1419_v1 }
 0x275   : > { %v574_v8 = vpop.permute.xlu0 %573  ;;  %v611_v9 = vpop.permute.xlu1 %610  ;;  %1252 = vmatpush3.msra.mxu0 %v915_v54 }
 0x276   : > { %579 = vst.msk [vmem:[#allocation2 + $0x1] sm:$0x1] %vm578_vm12, %v574_v8  ;;  %vm677_vm12 = vcmp.ge.s32.totalorder %v473_v41, 94  ;;  %1253 = vmatprep.subr.mxu0 %v1419_v1  ;;  %v1009_v8 = vld [vmem:[%s2073_s7 + $0x50] sm:$0xf] }
 0x277   : > { %601 = vst.msk [vmem:[#allocation2 + $0x1] sm:$0x1] %vm600_vm15, %v596_v60  ;;  %vm689_vm15 = vcmp.lt.s32.totalorder %v473_v41, 144  ;;  %vm679_vm1 = vmand %vm677_vm12, %vm678_vm13  ;;  %v740_v41 = vld [vmem:[%s2069_s3 + $0x178] sm:$0xff]  ;;  %1254 = vmatpush3.msra.mxu0 %v914_v55  ;;  %v909_v60 = vld [vmem:[%s2071_s5 + $0x8] sm:$0xff] }
 0x278   : > { %616 = vst.msk [vmem:[#allocation2 + $0x1] sm:$0x1] %vm615_vm3, %v611_v9  ;;  %vm690_vm2 = vmand %vm688_vm14, %vm689_vm15  ;;  %vm764_vm3 = vcmask 130048   ;;  %1255 = vmatprep.subr.mxu0 %v1419_v1  ;;  %v1008_v9 = vld [vmem:[%s2073_s7 + $0x48] sm:$0xff] }
 0x279   : > { %v630_v13 = vpop.permute.xlu0 %629  ;;  %627 = vst.msk [vmem:[#allocation2 + $0x1] sm:$0x3] %vm626_vm6, %v622_v11  ;;  %v652_v14 = vpop.permute.xlu1 %651  ;;  %1256 = vmatpush3.msra.mxu0 %v913_v56  ;;  %vm1015_vm6 = vcmask 1043456   ;;  %v1006_v11 = vld [vmem:[%s2073_s7 + $0x38] sm:$0xff] }
 0x27a   : > { %635 = vst.msk [vmem:[#allocation2 + $0x2] sm:$0x1] %vm634_vm7, %v630_v13  ;;  %1257 = vmatprep.subr.mxu0 %v1419_v1  ;;  %v1004_v13 = vld [vmem:[%s2073_s7 + $0x28] sm:$0xff]  ;;  %vm1011_vm7 = vcmask 687104  }
 0x27b   : > { %657 = vst.msk [vmem:[#allocation2 + $0x2] sm:$0x1] %vm656_vm8, %v652_v14  ;;  %1258 = vmatpush3.msra.mxu0 %v912_v57  ;;  %v1003_v14 = vld [vmem:[%s2073_s7 + $0x20] sm:$0xff]  ;;  %vm1089_vm8 = vcmask 73728  }
 0x27c   : > { %1259 = vmatprep.subr.mxu0 %v1419_v1 }
 0x27d   : > { %v683_v15 = vpop.permute.xlu0 %682  ;;  %v667_v16 = vpop.permute.xlu1 %666  ;;  %1260 = vmatpush3.msra.mxu0 %v911_v58 }
 0x27e   : > { %v684_v17 = vrot.slane %v683_v15, 7  ;;  %672 = vst.msk [vmem:[#allocation2 + $0x2] sm:$0x1] %vm671_vm11, %v667_v16  ;;  %1261 = vmatprep.subr.mxu0 %v1419_v1  ;;  %v1001_v16 = vld [vmem:[%s2073_s7 + $0x10] sm:$0xff] }
 0x27f   : > { %1262 = vmatpush3.msra.mxu0 %v910_v59 }
 0x280   : > { %v686_v19 = vsel %vm685_vm0, %v684_v17, %v683_v15  ;;  %1263 = vmatprep.subr.mxu0 %v1419_v1  ;;  %v1002_v15 = vld [vmem:[%s2073_s7 + $0x18] sm:$0xff]  ;;  %v1000_v17 = vld [vmem:[%s2073_s7 + $0x8] sm:$0xff] }
 0x281   : > { %v675_v18 = vpop.permute.xlu0 %674  ;;  %1264 = vmatpush3.msra.mxu0 %v909_v60 }
 0x282   : > { %680 = vst.msk [vmem:[#allocation2 + $0x2] sm:$0x1] %vm679_vm1, %v675_v18  ;;  %1265 = vmatprep.subr.mxu0 %v1419_v1  ;;  %v999_v18 = vld [vmem:[%s2073_s7] sm:$0xff] }
 0x283   : > { %691 = vst.msk [vmem:[#allocation2 + $0x2] sm:$0x3] %vm690_vm2, %v686_v19  ;;  %1266 = vmatpush3.msra.mxu0 %v908_v61  ;;  %v923_v19 = vld [vmem:[%s2072_s6] sm:$0x1] }
 0x284   : > { %1270 = vmatprep.subr.mxu0 %v1419_v1 }
 0x28a   : > { %v692_v23 = vld [vmem:[#allocation2] sm:$0xf] }
 0x28b   : > { %v752_v24 = vrot.slane %v692_v23, %v751_v20  ;;  %v748_v25 = vrot.slane %v692_v23, %v747_v21  ;;  %v760_v26 = vrot.slane %v692_v23, %v759_v22  ;;  %v756_v47 = vrot.slane %v692_v23, %v755_v44 }
 0x28d   : > { %831 = vmatprep.mubr.f32.mxu1 %v752_v24 }
 0x28e   : > { %832 = vmatmul.mubr.f32.vlgmr.msra.gmra.mxu1 %v748_v25 }
 0x28f   : > { %838 = vmatpush1.msra.mxu1 %v740_v41  ;;  %1167 = vmatprep.mubr.msk.f32.mxu1 %vm764_vm3, %v760_v26 }
 0x290   : > { %839 = vmatprep.subr.mxu1 %v1419_v1 }
 0x291   : > { %840 = vmatpush1.msra.mxu1 %v739_v27 }
 0x292   : > { %841 = vmatprep.subr.mxu1 %v1419_v1 }
 0x293   : > { %842 = vmatpush1.msra.mxu1 %v738_v28 }
 0x294   : > { %843 = vmatprep.subr.mxu1 %v1419_v1 }
 0x295   : > { %844 = vmatpush1.msra.mxu1 %v737_v29 }
 0x296   : > { %845 = vmatprep.subr.mxu1 %v1419_v1 }
 0x297   : > { %846 = vmatpush1.msra.mxu1 %v736_v30 }
 0x298   : > { %847 = vmatprep.subr.mxu1 %v1419_v1 }
 0x299   : > { %848 = vmatpush1.msra.mxu1 %v735_v31 }
 0x29a   : > { %849 = vmatprep.subr.mxu1 %v1419_v1 }
 0x29b   : > { %850 = vmatpush1.msra.mxu1 %v734_v32 }
 0x29c   : > { %851 = vmatprep.subr.mxu1 %v1419_v1 }
 0x29d   : > { %852 = vmatpush1.msra.mxu1 %v733_v33 }
 0x29e   : > { %853 = vmatprep.subr.mxu1 %v1419_v1 }
 0x29f   : > { %854 = vmatpush1.msra.mxu1 %v732_v34 }
 0x2a0   : > { %855 = vmatprep.subr.mxu1 %v1419_v1 }
 0x2a1   : > { %856 = vmatpush1.msra.mxu1 %v731_v35 }
 0x2a2   : > { %857 = vmatprep.subr.mxu1 %v1419_v1 }
 0x2a3   : > { %858 = vmatpush1.msra.mxu1 %v730_v36 }
 0x2a4   : > { %859 = vmatprep.subr.mxu1 %v1419_v1 }
 0x2a5   : > { %860 = vmatpush1.msra.mxu1 %v729_v37 }
 0x2a6   : > { %861 = vmatprep.subr.mxu1 %v1419_v1 }
 0x2a7   : > { %862 = vmatpush1.msra.mxu1 %v728_v38 }
 0x2a8   : > { %863 = vmatprep.subr.mxu1 %v1419_v1 }
 0x2a9   : > { %864 = vmatpush1.msra.mxu1 %v727_v39 }
 0x2aa   : > { %865 = vmatprep.subr.mxu1 %v1419_v1 }
 0x2ab   : > { %866 = vmatpush1.msra.mxu1 %v726_v40 }
 0x2ac   : > { %867 = vmatprep.subr.mxu1 %v1419_v1 }
 0x2ad   : > { %868 = vmatpush1.msra.mxu1 %v725_v42 }
 0x2ae   : > { %897 = vmatprep.subr.mxu1 %v1419_v1 }
 0x2af   : > { %898 = vmatpush2.msra.mxu1 %v742_v43 }
 0x2b0   : > { %899 = vmatprep.subr.mxu1 %v1419_v1 }
 0x2b1   : > { %900 = vmatpush2.msra.mxu1 %v741_v46 }
 0x2b2   : > { %902 = vmatmul.mubr.f32.vlgmr.msra.gmra.mxu1 %v756_v47 }
 0x34e   : > { %v1206_v62 = vpop.f32.mrf.mxu1 }
 0x350   : > { %v1207_v63 = vpop.f32.mrf.mxu1 }
 0x351   : > { %v1208_v0 = vadd.f32 %v1207_v63, %v1206_v62 }
 0x353   : > { %v834_v3 = vadd.f32 %v1208_v0, %v743_v2 }
 0x372   : > { %v903_v4 = vpop.f32.mrf.mxu1 }
 0x373   : > { %v904_v5 = vadd.f32 %v903_v4, %v834_v3 }
 0x374   : > { %v905_v6 = vpop.f32.mrf.mxu1 }
 0x375   : > { %v907_v7 = vmax.f32 %v904_v5, 0.0 }
 0x377   : > { %1268 = vmatmul.mubr.msk.f32.vlgmr.msra.gmra.mxu0 %vm924_vm5, %v907_v7 }
 0x378   : > { %1271 = vmatpush3.msk.msra.mxu0 %vm1015_vm6, %v1009_v8  ;;  %1292 = vmatprep.mubr.msk.f32.mxu0 %vm1439_vm4, %v1419_v1 }
 0x379   : > { %1272 = vmatprep.subr.mxu0 %v1419_v1 }
 0x37a   : > { %1273 = vmatpush3.msra.mxu0 %v1008_v9 }
 0x37b   : > { %1274 = vmatprep.subr.mxu0 %v1419_v1 }
 0x37c   : > { %1275 = vmatpush3.msra.mxu0 %v1007_v10 }
 0x37d   : > { %1276 = vmatprep.subr.mxu0 %v1419_v1 }
 0x37e   : > { %1277 = vmatpush3.msra.mxu0 %v1006_v11 }
 0x37f   : > { %1278 = vmatprep.subr.mxu0 %v1419_v1 }
 0x380   : > { %1279 = vmatpush3.msra.mxu0 %v1005_v12 }
 0x381   : > { %1280 = vmatprep.subr.mxu0 %v1419_v1 }
 0x382   : > { %1281 = vmatpush3.msra.mxu0 %v1004_v13 }
 0x383   : > { %1282 = vmatprep.subr.mxu0 %v1419_v1 }
 0x384   : > { %1283 = vmatpush3.msra.mxu0 %v1003_v14 }
 0x385   : > { %1284 = vmatprep.subr.mxu0 %v1419_v1 }
 0x386   : > { %1285 = vmatpush3.msra.mxu0 %v1002_v15 }
 0x387   : > { %1286 = vmatprep.subr.mxu0 %v1419_v1 }
 0x388   : > { %1287 = vmatpush3.msra.mxu0 %v1001_v16 }
 0x389   : > { %1288 = vmatprep.subr.mxu0 %v1419_v1 }
 0x38a   : > { %1289 = vmatpush3.msra.mxu0 %v1000_v17 }
 0x38b   : > { %1290 = vmatprep.subr.mxu0 %v1419_v1  ;;  %v1010_v1 = vld [vmem:[%s2074_s8] sm:$0x1] }
 0x38c   : > { %1291 = vmatpush3.msra.mxu0 %v999_v18 }
 0x437   : > { %v994_v20 = vpop.f32.mrf.mxu0 }
 0x438   : > { %v995_v21 = vadd.f32 %v994_v20, %v923_v19 }
 0x439   : > { %v1269_v22 = vpop.f32.mrf.mxu0 }
 0x43a   : > { %v998_v23 = vmax.f32 %v995_v21, 0.0 }
 0x43c   : > { %1293 = vmatmul.mubr.msk.f32.vlgmr.msra.gmra.mxu0 %vm1011_vm7, %v998_v23 }
 0x4fc   : > { %v1085_v24 = vpop.f32.mrf.mxu0 }
 0x4fd   : > { %v1086_v25 = vadd.f32 %v1085_v24, %v1010_v1 }
 0x4fe   : > { %v1294_v41 = vpop.f32.mrf.mxu0 }
 0x4ff   : > { %1090 = vst.msk [vmem:[%s324_s23] sm:$0x1] %vm1089_vm8, %v1086_v25 }
 0x500   : > { %1370 = shalt.err (!%p1367_p3)
}
 0x501   : > { %s1371_s21 = scalar_lea.hbm %s2031_s27, 16  ;;  %s1375_s23 = scalar_lea.hbm %s2075_s9, 32 }
 0x502   : > { %p1372_p4 = scmp.ne.s32.totalorder %s2031_s27, %s1371_s21  ;;  %p1376_p9 = scmp.lt.s32.totalorder %s2031_s27, %s2075_s9 }
 0x503   : > { %p1377_p10 = scmp.lt.s32.totalorder %s1375_s23, %s1371_s21 }
 0x504   : > { %p1373_p7 = pnand %p1372_p4, %p1529_p5 }
 0x505   : > { %p1378_p11 = por %p1377_p10, %p1376_p9 }
 0x506   : > { %p1374_p8 = pneg %p1373_p7 }
 0x508   : > { %p1379_p12 = pnand %p1378_p11, %p1374_p8 }
 0x50a   : > { %1382 = shalt.err (!%p1379_p12)
}
 0x50b   : > { %1296 = dma.vmem_to_hbm [thread:$0]  (%p1529_p5), %s1105_s24, 16, %s2031_s27, %s1092_s28  }
 0x50c PF: > { %p1302_p13 = scmp.ge.s32.totalorder %s1417_s12, 2  ;;  %s1116_s29 = sand.u32 1, %s1405_s30  }
 0x50d   : > { %s1117_s13 = scalar_lea.sflag [#allocation4], %s1116_s29 }
 0x50e   : > { %p1299_p0 = pnand %p1302_p13, %p1533_p6 }
 0x510   : > { %p1300_p1 = pneg %p1299_p0 }
 0x512   : > { %1400 = dma.done.wait (%p1300_p1), %s1117_s13, 16  }
 0x513   : > { %1402 = vsyncadd (%p1300_p1), %s1117_s13, 4294967280  ;;  %p19_p2 = scmp.ge.s32.totalorder %s1516_s15, 4   ;;  %s2106_s30 = smov %s1409_s10 }
 0x514   : > { %s2107_s10 = smov %s1413_s11  ;;  %s2108_s11 = smov %s1527_s18 }
 0x515   : > { %s2109_s12 = smov %s1516_s15  ;;  %21 = sbr.rel (!%p19_p2) target bundleno = 3 (0x3), region = 91 }
 0x51a   :  { %1121 = vsyncpa [#allocation4], 1 }
 0x51b   :  { %1123 = vsyncpa [#allocation4 + $0x1], 1 }

</bundles_post_ra>
